<compile_context>
chip_gen: v7x
topology: tpu7x:2x2x1
jax: 0.10.0
libtpu: 0.0.40
codegen_flags: <defaults>
</compile_context>

<pallas_src>
import math

import jax
import jax.numpy as jnp
from jax.experimental import pallas as pl
from jax.experimental.pallas import tpu as pltpu

# ----------------------- model hyper-parameters (small demo) -----------------------
D_MODEL = 32          # "dim_feedforward" in the PyTorch module == embedding dim
NHEAD = 4
NUM_LAYERS = 2
FFN_HIDDEN = 2048     # hardcoded in the PyTorch module (linear1/linear2)
FFN_CHUNK = 512       # FFN hidden-dim chunk (bounds live vregs, overlaps MXU work)
SEQ = 8
BATCH = 2
LN_EPS = 1e-5

HD = D_MODEL // NHEAD


def _batches_per_step():
    """v7x has 2 TensorCores per chip: give each core its own batch via the leading
    'parallel' grid axis (1 batch per grid step). Single-TC v5e/v6e keep all batches
    in one grid step so the layer loop has the fewest steps."""
    try:
        kind = jax.devices()[0].device_kind.lower()
    except Exception:
        kind = ""
    multi_tc = any(tag in kind for tag in ("v7", "7x"))
    return 1 if multi_tc else BATCH


NB = _batches_per_step()       # batches processed per grid step
assert BATCH % NB == 0
TOKENS = NB * SEQ              # tokens processed per grid step


def _layer_norm(x, gamma, beta):
    mu = jnp.mean(x, axis=-1, keepdims=True)
    var = jnp.mean((x - mu) ** 2, axis=-1, keepdims=True)
    return (x - mu) * jax.lax.rsqrt(var + LN_EPS) * gamma + beta


def _fused_encoder_kernel(x_ref,                              # (NB, L, E) f32
                          wqkv_ref, bqkv_ref,                 # (1, E, 3E) bf16 / (1, 1, 3E) f32
                          wo_ref, bo_ref,                     # (1, E, E) bf16 / (1, 1, E) f32
                          w1_ref, b1_ref,                     # (1, E, FFN) bf16 / (1, 1, FFN) f32
                          w2_ref, b2_ref,                     # (1, FFN, E) bf16 / (1, 1, E) f32
                          g1_ref, bt1_ref, g2_ref, bt2_ref,   # LayerNorm params, (1, 1, E) f32
                          o_ref,                              # (NB, L, E) f32
                          x_sc):                              # VMEM (TOKENS, E) f32, layer-resident
    L, E, H = SEQ, D_MODEL, NHEAD
    layer = pl.program_id(1)

    # First layer of each batch block: pull the input into the VMEM-resident activation
    # scratch, flattened token-major as (NB*L, E).
    @pl.when(layer == 0)
    def _load():
        x_sc[...] = x_ref[...].reshape(TOKENS, E)

    x = x_sc[...]                                             # (T, E) f32
    xb = x.astype(jnp.bfloat16)

    # ---------------- multi-head self-attention ----------------
    # Single fused lane-dense QKV projection; 1/sqrt(HD) is folded into the q columns at init.
    qkv = jnp.dot(xb, wqkv_ref[0],
                  preferred_element_type=jnp.float32) + bqkv_ref[0]        # (T, 3E) f32

    ctx_heads = []
    for h in range(H):
        qh = qkv[:, h * HD:(h + 1) * HD].reshape(NB, L, HD).astype(jnp.bfloat16)
        kh = qkv[:, E + h * HD:E + (h + 1) * HD].reshape(NB, L, HD).astype(jnp.bfloat16)
        vh = qkv[:, 2 * E + h * HD:2 * E + (h + 1) * HD].reshape(NB, L, HD).astype(jnp.bfloat16)

        s = jnp.einsum('bld,bmd->blm', qh, kh,
                       preferred_element_type=jnp.float32)                 # (NB, L, L) f32
        s = s - jnp.max(s, axis=-1, keepdims=True)
        p = jnp.exp(s)
        p = p * pl.reciprocal(jnp.sum(p, axis=-1, keepdims=True), approx=True)
        ctx = jnp.einsum('blm,bmd->bld', p.astype(jnp.bfloat16), vh,
                         preferred_element_type=jnp.float32)               # (NB, L, HD) f32
        ctx_heads.append(ctx.reshape(TOKENS, HD))

    # Fused out-projection: lane-concat the per-head contexts and hit the MXU once.
    ctx_all = jnp.concatenate(ctx_heads, axis=-1).astype(jnp.bfloat16)     # (T, E) bf16
    attn = jnp.dot(ctx_all, wo_ref[0],
                   preferred_element_type=jnp.float32) + bo_ref[0]         # (T, E) f32

    # residual + LayerNorm1 (post-norm, biased variance, f32 math)
    src = _layer_norm(x + attn, g1_ref[0], bt1_ref[0])

    # ---------------- feed-forward (relu), chunked over the hidden dim ----------------
    src_b = src.astype(jnp.bfloat16)
    ff = jnp.zeros((TOKENS, E), jnp.float32) + b2_ref[0]
    for c in range(FFN_HIDDEN // FFN_CHUNK):
        lo = c * FFN_CHUNK
        hc = jnp.dot(src_b, w1_ref[0, :, lo:lo + FFN_CHUNK],
                     preferred_element_type=jnp.float32) + b1_ref[0, :, lo:lo + FFN_CHUNK]
        hc = jnp.maximum(hc.astype(jnp.bfloat16), 0.0)                     # relu after cast
        ff = ff + jnp.dot(hc, w2_ref[0, lo:lo + FFN_CHUNK, :],
                          preferred_element_type=jnp.float32)

    # residual + LayerNorm2
    src = _layer_norm(src + ff, g2_ref[0], bt2_ref[0])

    x_sc[...] = src
    # Cheap unconditional VMEM write every step; HBM writeback only happens when the batch
    # block index changes / at grid end.
    o_ref[...] = src.reshape(NB, L, E)


def _weight_spec(arr):
    # One layer's slice of a stacked (num_layers, ...) weight tensor (all 3-D).
    return pl.BlockSpec((1,) + arr.shape[1:], lambda b, l: (l, 0, 0))


@jax.jit
def encoder_transformer(src_lne, params):
    """src_lne: (L, N, E) — PyTorch nn.MultiheadAttention default layout."""
    L, N, E = src_lne.shape
    x = jnp.transpose(src_lne.astype(jnp.float32), (1, 0, 2))              # (N, L, E), ~2 KiB

    weight_specs = [_weight_spec(w) for w in params]
    out = pl.pallas_call(
        _fused_encoder_kernel,
        out_shape=jax.ShapeDtypeStruct((N, L, E), jnp.float32),
        grid_spec=pltpu.PrefetchScalarGridSpec(
            num_scalar_prefetch=0,
            grid=(N // NB, NUM_LAYERS),
            in_specs=[pl.BlockSpec((NB, L, E), lambda b, l: (b, 0, 0))] + weight_specs,
            out_specs=pl.BlockSpec((NB, L, E), lambda b, l: (b, 0, 0)),
            scratch_shapes=[pltpu.VMEM((TOKENS, D_MODEL), jnp.float32)],
        ),
        compiler_params=pltpu.CompilerParams(
            # Batch blocks are independent (megacore-shardable on v7x); layers are
            # sequentially dependent through the VMEM activation scratch.
            dimension_semantics=("parallel", "arbitrary"),
            # ~1.5 MiB of double-buffered weights + tiny activations; safe on v5e/v6e/v7x.
            vmem_limit_bytes=16 << 20,
        ),
    )(x, *params)
    return jnp.transpose(out, (1, 0, 2))                                   # back to (L, N, E)


def init_params(key, num_layers=NUM_LAYERS, d_model=D_MODEL, nhead=NHEAD,
                hidden=FFN_HIDDEN):
    """Deterministic init. QKV weights fused into one (E, 3E) matrix with one (1, 3E) bias
    (attention scale folded into the q columns), out-proj stored as (E, E), linear1 as
    (E, FFN), linear2 pre-transposed to (FFN, E); matmul weights cast to bf16."""
    hd = d_model // nhead
    scale = 1.0 / math.sqrt(hd)
    s = 0.02
    layers = []
    for i in range(num_layers):
        ks = jax.random.split(jax.random.fold_in(key, i), 4)
        wqkv = jax.random.normal(ks[0], (d_model, 3 * d_model), jnp.float32) * s
        bqkv = jnp.zeros((1, 3 * d_model), jnp.float32)
        # fold the 1/sqrt(hd) attention scale into the q projection columns
        wqkv = wqkv.at[:, :d_model].multiply(scale)
        bqkv = bqkv.at[:, :d_model].multiply(scale)
        wo = jax.random.normal(ks[1], (d_model, d_model), jnp.float32) * s    # (H*HD, E)
        bo = jnp.zeros((1, d_model), jnp.float32)
        w1 = jax.random.normal(ks[2], (d_model, hidden), jnp.float32) * s     # (E, FFN)
        b1 = jnp.zeros((1, hidden), jnp.float32)
        w2 = jax.random.normal(ks[3], (hidden, d_model), jnp.float32) * s     # (FFN, E)
        b2 = jnp.zeros((1, d_model), jnp.float32)
        g1 = jnp.ones((1, d_model), jnp.float32)
        bt1 = jnp.zeros((1, d_model), jnp.float32)
        g2 = jnp.ones((1, d_model), jnp.float32)
        bt2 = jnp.zeros((1, d_model), jnp.float32)
        layers.append((wqkv, bqkv, wo, bo, w1, b1, w2, b2, g1, bt1, g2, bt2))

    bf16_idx = {0, 2, 4, 6}   # wqkv, wo, w1, w2
    stacked = []
    for j in range(12):
        arr = jnp.stack([lyr[j] for lyr in layers], axis=0)   # leading layer axis
        if j in bf16_idx:
            arr = arr.astype(jnp.bfloat16)
        stacked.append(arr)
    return tuple(stacked)


if __name__ == "__main__":
    key = jax.random.PRNGKey(0)
    k_x, k_p = jax.random.split(key)

    src = jax.random.normal(k_x, (SEQ, BATCH, D_MODEL), jnp.float32)   # (L, N, E)
    params = init_params(k_p)

    out = encoder_transformer(src, params)
    jax.block_until_ready(out)

    assert out.shape == (SEQ, BATCH, D_MODEL), out.shape
    assert bool(jnp.all(jnp.isfinite(out)))
    print("KERNEL_OK")
</pallas_src>

<mosaic_0001>
module attributes {stable_mosaic.version = 11 : i64} {
  func.func @_fused_encoder_kernel(%arg0: i32, %arg1: i32, %arg2: memref<2x8x32xf32, #tpu.memory_space<vmem>>, %arg3: memref<1x32x96xbf16, #tpu.memory_space<vmem>>, %arg4: memref<1x1x96xf32, #tpu.memory_space<vmem>>, %arg5: memref<1x32x32xbf16, #tpu.memory_space<vmem>>, %arg6: memref<1x1x32xf32, #tpu.memory_space<vmem>>, %arg7: memref<1x32x2048xbf16, #tpu.memory_space<vmem>>, %arg8: memref<1x1x2048xf32, #tpu.memory_space<vmem>>, %arg9: memref<1x2048x32xbf16, #tpu.memory_space<vmem>>, %arg10: memref<1x1x32xf32, #tpu.memory_space<vmem>>, %arg11: memref<1x1x32xf32, #tpu.memory_space<vmem>>, %arg12: memref<1x1x32xf32, #tpu.memory_space<vmem>>, %arg13: memref<1x1x32xf32, #tpu.memory_space<vmem>>, %arg14: memref<1x1x32xf32, #tpu.memory_space<vmem>>, %arg15: memref<2x8x32xf32, #tpu.memory_space<vmem>>, %arg16: memref<16x32xf32, #tpu.memory_space<vmem>>) attributes {dimension_semantics = [#tpu.dimension_semantics<parallel>, #tpu.dimension_semantics<arbitrary>], iteration_bounds = array<i64: 1, 2>, scalar_prefetch = 0 : i64, scratch_operands = 1 : i64, tpu.core_type = #tpu.core_type<tc>, window_params = [{transform_indices = @transform_0, window_bounds = array<i64: 2, 8, 32>}, {transform_indices = @transform_1, window_bounds = array<i64: 1, 32, 96>}, {transform_indices = @transform_2, window_bounds = array<i64: 1, 1, 96>}, {transform_indices = @transform_3, window_bounds = array<i64: 1, 32, 32>}, {transform_indices = @transform_4, window_bounds = array<i64: 1, 1, 32>}, {transform_indices = @transform_5, window_bounds = array<i64: 1, 32, 2048>}, {transform_indices = @transform_6, window_bounds = array<i64: 1, 1, 2048>}, {transform_indices = @transform_7, window_bounds = array<i64: 1, 2048, 32>}, {transform_indices = @transform_8, window_bounds = array<i64: 1, 1, 32>}, {transform_indices = @transform_9, window_bounds = array<i64: 1, 1, 32>}, {transform_indices = @transform_10, window_bounds = array<i64: 1, 1, 32>}, {transform_indices = @transform_11, window_bounds = array<i64: 1, 1, 32>}, {transform_indices = @transform_12, window_bounds = array<i64: 1, 1, 32>}, {transform_indices = @transform_13, window_bounds = array<i64: 2, 8, 32>}]} {
    %c0_i32 = arith.constant 0 : i32
    %0 = arith.cmpi eq, %arg1, %c0_i32 : i32
    %1 = arith.extui %0 : i1 to i32
    %c0_i32_0 = arith.constant 0 : i32
    %2 = arith.cmpi ne, %1, %c0_i32_0 : i32
    scf.if %2 {
      %c0_107 = arith.constant 0 : index
      %c0_108 = arith.constant 0 : index
      %c0_109 = arith.constant 0 : index
      %232 = vector.load %arg2[%c0_107, %c0_108, %c0_109] : memref<2x8x32xf32, #tpu.memory_space<vmem>>, vector<2x8x32xf32>
      %233 = vector.shape_cast %232 : vector<2x8x32xf32> to vector<16x32xf32>
      %c0_110 = arith.constant 0 : index
      %c0_111 = arith.constant 0 : index
      %234 = vector.load %arg16[%c0_110, %c0_111] : memref<16x32xf32, #tpu.memory_space<vmem>>, vector<16x32xf32>
      tpu.vector_store %arg16[%c0_110, %c0_111], %233 {strides = array<i32>} : memref<16x32xf32, #tpu.memory_space<vmem>>, vector<16x32xf32>,
    } else {
    }
    %c0 = arith.constant 0 : index
    %c0_1 = arith.constant 0 : index
    %3 = vector.load %arg16[%c0, %c0_1] : memref<16x32xf32, #tpu.memory_space<vmem>>, vector<16x32xf32>
    %4 = arith.truncf %3 : vector<16x32xf32> to vector<16x32xbf16>
    %c0_2 = arith.constant 0 : index
    %c0_3 = arith.constant 0 : index
    %c0_4 = arith.constant 0 : index
    %5 = vector.load %arg3[%c0_2, %c0_3, %c0_4] : memref<1x32x96xbf16, #tpu.memory_space<vmem>>, vector<1x32x96xbf16>
    %6 = vector.shape_cast %5 : vector<1x32x96xbf16> to vector<32x96xbf16>
    %cst = arith.constant dense<0.000000e+00> : vector<16x96xf32>
    %7 = tpu.matmul %4, %6, %cst {dimension_numbers = #tpu.dot_dimension_numbers<[1], [0], [0], [1], [0, 0, 1, 1], [], []>} : vector<16x32xbf16>, vector<32x96xbf16>, vector<16x96xf32> -> vector<16x96xf32>
    %c0_5 = arith.constant 0 : index
    %c0_6 = arith.constant 0 : index
    %c0_7 = arith.constant 0 : index
    %8 = vector.load %arg4[%c0_5, %c0_6, %c0_7] : memref<1x1x96xf32, #tpu.memory_space<vmem>>, vector<1x1x96xf32>
    %9 = vector.shape_cast %8 : vector<1x1x96xf32> to vector<1x96xf32>
    %10 = vector.broadcast %9 : vector<1x96xf32> to vector<16x96xf32>
    %11 = arith.addf %7, %10 : vector<16x96xf32>
    %12 = vector.extract_strided_slice %11 {offsets = [0, 0], sizes = [16, 8], strides = [1, 1]} : vector<16x96xf32> to vector<16x8xf32>
    %13 = vector.shape_cast %12 : vector<16x8xf32> to vector<2x8x8xf32>
    %14 = arith.truncf %13 : vector<2x8x8xf32> to vector<2x8x8xbf16>
    %15 = vector.extract_strided_slice %11 {offsets = [0, 32], sizes = [16, 8], strides = [1, 1]} : vector<16x96xf32> to vector<16x8xf32>
    %16 = vector.shape_cast %15 : vector<16x8xf32> to vector<2x8x8xf32>
    %17 = arith.truncf %16 : vector<2x8x8xf32> to vector<2x8x8xbf16>
    %18 = vector.extract_strided_slice %11 {offsets = [0, 64], sizes = [16, 8], strides = [1, 1]} : vector<16x96xf32> to vector<16x8xf32>
    %19 = vector.shape_cast %18 : vector<16x8xf32> to vector<2x8x8xf32>
    %20 = arith.truncf %19 : vector<2x8x8xf32> to vector<2x8x8xbf16>
    "tpu.trace_start"() <{level = 10 : i32, message = "bld,bmd->blm"}> : () -> ()
    %cst_8 = arith.constant dense<0.000000e+00> : vector<2x8x8xf32>
    %21 = tpu.matmul %14, %17, %cst_8 {dimension_numbers = #tpu.dot_dimension_numbers<[2], [2], [1], [1], [0, 0, 0, 1, 1, 1], [0], [0]>} : vector<2x8x8xbf16>, vector<2x8x8xbf16>, vector<2x8x8xf32> -> vector<2x8x8xf32>
    "tpu.trace_stop"() : () -> ()
    %cst_9 = arith.constant dense<0xFF800000> : vector<2x8xf32>
    %22 = vector.multi_reduction <maximumf>, %21, %cst_9 [2] : vector<2x8x8xf32> to vector<2x8xf32>
    %23 = vector.shape_cast %22 : vector<2x8xf32> to vector<2x8x1xf32>
    %24 = vector.broadcast %23 : vector<2x8x1xf32> to vector<2x8x8xf32>
    %25 = arith.subf %21, %24 : vector<2x8x8xf32>
    %26 = math.exp %25 : vector<2x8x8xf32>
    %cst_10 = arith.constant dense<0.000000e+00> : vector<2x8xf32>
    %27 = vector.multi_reduction <add>, %26, %cst_10 [2] : vector<2x8x8xf32> to vector<2x8xf32>
    %28 = vector.shape_cast %27 : vector<2x8xf32> to vector<2x8x1xf32>
    %29 = tpu.reciprocal %28 {approx = true} : vector<2x8x1xf32> -> vector<2x8x1xf32>
    %30 = vector.broadcast %29 : vector<2x8x1xf32> to vector<2x8x8xf32>
    %31 = arith.mulf %26, %30 : vector<2x8x8xf32>
    %32 = arith.truncf %31 : vector<2x8x8xf32> to vector<2x8x8xbf16>
    "tpu.trace_start"() <{level = 10 : i32, message = "blm,bmd->bld"}> : () -> ()
    %cst_11 = arith.constant dense<0.000000e+00> : vector<2x8x8xf32>
    %33 = tpu.matmul %32, %20, %cst_11 {dimension_numbers = #tpu.dot_dimension_numbers<[2], [1], [1], [2], [0, 0, 0, 1, 1, 2], [0], [0]>} : vector<2x8x8xbf16>, vector<2x8x8xbf16>, vector<2x8x8xf32> -> vector<2x8x8xf32>
    "tpu.trace_stop"() : () -> ()
    %34 = vector.shape_cast %33 : vector<2x8x8xf32> to vector<16x8xf32>
    %35 = vector.extract_strided_slice %11 {offsets = [0, 8], sizes = [16, 8], strides = [1, 1]} : vector<16x96xf32> to vector<16x8xf32>
    %36 = vector.shape_cast %35 : vector<16x8xf32> to vector<2x8x8xf32>
    %37 = arith.truncf %36 : vector<2x8x8xf32> to vector<2x8x8xbf16>
    %38 = vector.extract_strided_slice %11 {offsets = [0, 40], sizes = [16, 8], strides = [1, 1]} : vector<16x96xf32> to vector<16x8xf32>
    %39 = vector.shape_cast %38 : vector<16x8xf32> to vector<2x8x8xf32>
    %40 = arith.truncf %39 : vector<2x8x8xf32> to vector<2x8x8xbf16>
    %41 = vector.extract_strided_slice %11 {offsets = [0, 72], sizes = [16, 8], strides = [1, 1]} : vector<16x96xf32> to vector<16x8xf32>
    %42 = vector.shape_cast %41 : vector<16x8xf32> to vector<2x8x8xf32>
    %43 = arith.truncf %42 : vector<2x8x8xf32> to vector<2x8x8xbf16>
    "tpu.trace_start"() <{level = 10 : i32, message = "bld,bmd->blm"}> : () -> ()
    %cst_12 = arith.constant dense<0.000000e+00> : vector<2x8x8xf32>
    %44 = tpu.matmul %37, %40, %cst_12 {dimension_numbers = #tpu.dot_dimension_numbers<[2], [2], [1], [1], [0, 0, 0, 1, 1, 1], [0], [0]>} : vector<2x8x8xbf16>, vector<2x8x8xbf16>, vector<2x8x8xf32> -> vector<2x8x8xf32>
    "tpu.trace_stop"() : () -> ()
    %cst_13 = arith.constant dense<0xFF800000> : vector<2x8xf32>
    %45 = vector.multi_reduction <maximumf>, %44, %cst_13 [2] : vector<2x8x8xf32> to vector<2x8xf32>
    %46 = vector.shape_cast %45 : vector<2x8xf32> to vector<2x8x1xf32>
    %47 = vector.broadcast %46 : vector<2x8x1xf32> to vector<2x8x8xf32>
    %48 = arith.subf %44, %47 : vector<2x8x8xf32>
    %49 = math.exp %48 : vector<2x8x8xf32>
    %cst_14 = arith.constant dense<0.000000e+00> : vector<2x8xf32>
    %50 = vector.multi_reduction <add>, %49, %cst_14 [2] : vector<2x8x8xf32> to vector<2x8xf32>
    %51 = vector.shape_cast %50 : vector<2x8xf32> to vector<2x8x1xf32>
    %52 = tpu.reciprocal %51 {approx = true} : vector<2x8x1xf32> -> vector<2x8x1xf32>
    %53 = vector.broadcast %52 : vector<2x8x1xf32> to vector<2x8x8xf32>
    %54 = arith.mulf %49, %53 : vector<2x8x8xf32>
    %55 = arith.truncf %54 : vector<2x8x8xf32> to vector<2x8x8xbf16>
    "tpu.trace_start"() <{level = 10 : i32, message = "blm,bmd->bld"}> : () -> ()
    %cst_15 = arith.constant dense<0.000000e+00> : vector<2x8x8xf32>
    %56 = tpu.matmul %55, %43, %cst_15 {dimension_numbers = #tpu.dot_dimension_numbers<[2], [1], [1], [2], [0, 0, 0, 1, 1, 2], [0], [0]>} : vector<2x8x8xbf16>, vector<2x8x8xbf16>, vector<2x8x8xf32> -> vector<2x8x8xf32>
    "tpu.trace_stop"() : () -> ()
    %57 = vector.shape_cast %56 : vector<2x8x8xf32> to vector<16x8xf32>
    %58 = vector.extract_strided_slice %11 {offsets = [0, 16], sizes = [16, 8], strides = [1, 1]} : vector<16x96xf32> to vector<16x8xf32>
    %59 = vector.shape_cast %58 : vector<16x8xf32> to vector<2x8x8xf32>
    %60 = arith.truncf %59 : vector<2x8x8xf32> to vector<2x8x8xbf16>
    %61 = vector.extract_strided_slice %11 {offsets = [0, 48], sizes = [16, 8], strides = [1, 1]} : vector<16x96xf32> to vector<16x8xf32>
    %62 = vector.shape_cast %61 : vector<16x8xf32> to vector<2x8x8xf32>
    %63 = arith.truncf %62 : vector<2x8x8xf32> to vector<2x8x8xbf16>
    %64 = vector.extract_strided_slice %11 {offsets = [0, 80], sizes = [16, 8], strides = [1, 1]} : vector<16x96xf32> to vector<16x8xf32>
    %65 = vector.shape_cast %64 : vector<16x8xf32> to vector<2x8x8xf32>
    %66 = arith.truncf %65 : vector<2x8x8xf32> to vector<2x8x8xbf16>
    "tpu.trace_start"() <{level = 10 : i32, message = "bld,bmd->blm"}> : () -> ()
    %cst_16 = arith.constant dense<0.000000e+00> : vector<2x8x8xf32>
    %67 = tpu.matmul %60, %63, %cst_16 {dimension_numbers = #tpu.dot_dimension_numbers<[2], [2], [1], [1], [0, 0, 0, 1, 1, 1], [0], [0]>} : vector<2x8x8xbf16>, vector<2x8x8xbf16>, vector<2x8x8xf32> -> vector<2x8x8xf32>
    "tpu.trace_stop"() : () -> ()
    %cst_17 = arith.constant dense<0xFF800000> : vector<2x8xf32>
    %68 = vector.multi_reduction <maximumf>, %67, %cst_17 [2] : vector<2x8x8xf32> to vector<2x8xf32>
    %69 = vector.shape_cast %68 : vector<2x8xf32> to vector<2x8x1xf32>
    %70 = vector.broadcast %69 : vector<2x8x1xf32> to vector<2x8x8xf32>
    %71 = arith.subf %67, %70 : vector<2x8x8xf32>
    %72 = math.exp %71 : vector<2x8x8xf32>
    %cst_18 = arith.constant dense<0.000000e+00> : vector<2x8xf32>
    %73 = vector.multi_reduction <add>, %72, %cst_18 [2] : vector<2x8x8xf32> to vector<2x8xf32>
    %74 = vector.shape_cast %73 : vector<2x8xf32> to vector<2x8x1xf32>
    %75 = tpu.reciprocal %74 {approx = true} : vector<2x8x1xf32> -> vector<2x8x1xf32>
    %76 = vector.broadcast %75 : vector<2x8x1xf32> to vector<2x8x8xf32>
    %77 = arith.mulf %72, %76 : vector<2x8x8xf32>
    %78 = arith.truncf %77 : vector<2x8x8xf32> to vector<2x8x8xbf16>
    "tpu.trace_start"() <{level = 10 : i32, message = "blm,bmd->bld"}> : () -> ()
    %cst_19 = arith.constant dense<0.000000e+00> : vector<2x8x8xf32>
    %79 = tpu.matmul %78, %66, %cst_19 {dimension_numbers = #tpu.dot_dimension_numbers<[2], [1], [1], [2], [0, 0, 0, 1, 1, 2], [0], [0]>} : vector<2x8x8xbf16>, vector<2x8x8xbf16>, vector<2x8x8xf32> -> vector<2x8x8xf32>
    "tpu.trace_stop"() : () -> ()
    %80 = vector.shape_cast %79 : vector<2x8x8xf32> to vector<16x8xf32>
    %81 = vector.extract_strided_slice %11 {offsets = [0, 24], sizes = [16, 8], strides = [1, 1]} : vector<16x96xf32> to vector<16x8xf32>
    %82 = vector.shape_cast %81 : vector<16x8xf32> to vector<2x8x8xf32>
    %83 = arith.truncf %82 : vector<2x8x8xf32> to vector<2x8x8xbf16>
    %84 = vector.extract_strided_slice %11 {offsets = [0, 56], sizes = [16, 8], strides = [1, 1]} : vector<16x96xf32> to vector<16x8xf32>
    %85 = vector.shape_cast %84 : vector<16x8xf32> to vector<2x8x8xf32>
    %86 = arith.truncf %85 : vector<2x8x8xf32> to vector<2x8x8xbf16>
    %87 = vector.extract_strided_slice %11 {offsets = [0, 88], sizes = [16, 8], strides = [1, 1]} : vector<16x96xf32> to vector<16x8xf32>
    %88 = vector.shape_cast %87 : vector<16x8xf32> to vector<2x8x8xf32>
    %89 = arith.truncf %88 : vector<2x8x8xf32> to vector<2x8x8xbf16>
    "tpu.trace_start"() <{level = 10 : i32, message = "bld,bmd->blm"}> : () -> ()
    %cst_20 = arith.constant dense<0.000000e+00> : vector<2x8x8xf32>
    %90 = tpu.matmul %83, %86, %cst_20 {dimension_numbers = #tpu.dot_dimension_numbers<[2], [2], [1], [1], [0, 0, 0, 1, 1, 1], [0], [0]>} : vector<2x8x8xbf16>, vector<2x8x8xbf16>, vector<2x8x8xf32> -> vector<2x8x8xf32>
    "tpu.trace_stop"() : () -> ()
    %cst_21 = arith.constant dense<0xFF800000> : vector<2x8xf32>
    %91 = vector.multi_reduction <maximumf>, %90, %cst_21 [2] : vector<2x8x8xf32> to vector<2x8xf32>
    %92 = vector.shape_cast %91 : vector<2x8xf32> to vector<2x8x1xf32>
    %93 = vector.broadcast %92 : vector<2x8x1xf32> to vector<2x8x8xf32>
    %94 = arith.subf %90, %93 : vector<2x8x8xf32>
    %95 = math.exp %94 : vector<2x8x8xf32>
    %cst_22 = arith.constant dense<0.000000e+00> : vector<2x8xf32>
    %96 = vector.multi_reduction <add>, %95, %cst_22 [2] : vector<2x8x8xf32> to vector<2x8xf32>
    %97 = vector.shape_cast %96 : vector<2x8xf32> to vector<2x8x1xf32>
    %98 = tpu.reciprocal %97 {approx = true} : vector<2x8x1xf32> -> vector<2x8x1xf32>
    %99 = vector.broadcast %98 : vector<2x8x1xf32> to vector<2x8x8xf32>
    %100 = arith.mulf %95, %99 : vector<2x8x8xf32>
    %101 = arith.truncf %100 : vector<2x8x8xf32> to vector<2x8x8xbf16>
    "tpu.trace_start"() <{level = 10 : i32, message = "blm,bmd->bld"}> : () -> ()
    %cst_23 = arith.constant dense<0.000000e+00> : vector<2x8x8xf32>
    %102 = tpu.matmul %101, %89, %cst_23 {dimension_numbers = #tpu.dot_dimension_numbers<[2], [1], [1], [2], [0, 0, 0, 1, 1, 2], [0], [0]>} : vector<2x8x8xbf16>, vector<2x8x8xbf16>, vector<2x8x8xf32> -> vector<2x8x8xf32>
    "tpu.trace_stop"() : () -> ()
    %103 = vector.shape_cast %102 : vector<2x8x8xf32> to vector<16x8xf32>
    %104 = tpu.concatenate %34, %57, %80, %103 in 1 : vector<16x8xf32>, vector<16x8xf32>, vector<16x8xf32>, vector<16x8xf32> -> vector<16x32xf32>
    %105 = arith.truncf %104 : vector<16x32xf32> to vector<16x32xbf16>
    %c0_24 = arith.constant 0 : index
    %c0_25 = arith.constant 0 : index
    %c0_26 = arith.constant 0 : index
    %106 = vector.load %arg5[%c0_24, %c0_25, %c0_26] : memref<1x32x32xbf16, #tpu.memory_space<vmem>>, vector<1x32x32xbf16>
    %107 = vector.shape_cast %106 : vector<1x32x32xbf16> to vector<32x32xbf16>
    %cst_27 = arith.constant dense<0.000000e+00> : vector<16x32xf32>
    %108 = tpu.matmul %105, %107, %cst_27 {dimension_numbers = #tpu.dot_dimension_numbers<[1], [0], [0], [1], [0, 0, 1, 1], [], []>} : vector<16x32xbf16>, vector<32x32xbf16>, vector<16x32xf32> -> vector<16x32xf32>
    %c0_28 = arith.constant 0 : index
    %c0_29 = arith.constant 0 : index
    %c0_30 = arith.constant 0 : index
    %109 = vector.load %arg6[%c0_28, %c0_29, %c0_30] : memref<1x1x32xf32, #tpu.memory_space<vmem>>, vector<1x1x32xf32>
    %110 = vector.shape_cast %109 : vector<1x1x32xf32> to vector<1x32xf32>
    %111 = vector.broadcast %110 : vector<1x32xf32> to vector<16x32xf32>
    %112 = arith.addf %108, %111 : vector<16x32xf32>
    %113 = arith.addf %3, %112 : vector<16x32xf32>
    %c0_31 = arith.constant 0 : index
    %c0_32 = arith.constant 0 : index
    %c0_33 = arith.constant 0 : index
    %114 = vector.load %arg11[%c0_31, %c0_32, %c0_33] : memref<1x1x32xf32, #tpu.memory_space<vmem>>, vector<1x1x32xf32>
    %115 = vector.shape_cast %114 : vector<1x1x32xf32> to vector<1x32xf32>
    %c0_34 = arith.constant 0 : index
    %c0_35 = arith.constant 0 : index
    %c0_36 = arith.constant 0 : index
    %116 = vector.load %arg12[%c0_34, %c0_35, %c0_36] : memref<1x1x32xf32, #tpu.memory_space<vmem>>, vector<1x1x32xf32>
    %117 = vector.shape_cast %116 : vector<1x1x32xf32> to vector<1x32xf32>
    %cst_37 = arith.constant dense<0.000000e+00> : vector<16xf32>
    %118 = vector.multi_reduction <add>, %113, %cst_37 [1] : vector<16x32xf32> to vector<16xf32>
    %119 = vector.shape_cast %118 : vector<16xf32> to vector<16x1xf32>
    %cst_38 = arith.constant 3.200000e+01 : f32
    %120 = vector.broadcast %cst_38 : f32 to vector<16x1xf32>
    %121 = arith.divf %119, %120 : vector<16x1xf32>
    %122 = vector.broadcast %121 : vector<16x1xf32> to vector<16x32xf32>
    %123 = arith.subf %113, %122 : vector<16x32xf32>
    %124 = arith.mulf %123, %123 : vector<16x32xf32>
    %cst_39 = arith.constant dense<0.000000e+00> : vector<16xf32>
    %125 = vector.multi_reduction <add>, %124, %cst_39 [1] : vector<16x32xf32> to vector<16xf32>
    %126 = vector.shape_cast %125 : vector<16xf32> to vector<16x1xf32>
    %cst_40 = arith.constant 3.200000e+01 : f32
    %127 = vector.broadcast %cst_40 : f32 to vector<16x1xf32>
    %128 = arith.divf %126, %127 : vector<16x1xf32>
    %129 = vector.broadcast %121 : vector<16x1xf32> to vector<16x32xf32>
    %130 = arith.subf %113, %129 : vector<16x32xf32>
    %cst_41 = arith.constant 9.99999974E-6 : f32
    %131 = vector.broadcast %cst_41 : f32 to vector<16x1xf32>
    %132 = arith.addf %128, %131 : vector<16x1xf32>
    %133 = math.rsqrt %132 : vector<16x1xf32>
    %134 = vector.broadcast %133 : vector<16x1xf32> to vector<16x32xf32>
    %135 = arith.mulf %130, %134 : vector<16x32xf32>
    %136 = vector.broadcast %115 : vector<1x32xf32> to vector<16x32xf32>
    %137 = arith.mulf %135, %136 : vector<16x32xf32>
    %138 = vector.broadcast %117 : vector<1x32xf32> to vector<16x32xf32>
    %139 = arith.addf %137, %138 : vector<16x32xf32>
    %140 = arith.truncf %139 : vector<16x32xf32> to vector<16x32xbf16>
    %cst_42 = arith.constant 0.000000e+00 : f32
    %141 = vector.broadcast %cst_42 : f32 to vector<16x32xf32>
    %c0_43 = arith.constant 0 : index
    %c0_44 = arith.constant 0 : index
    %c0_45 = arith.constant 0 : index
    %142 = vector.load %arg10[%c0_43, %c0_44, %c0_45] : memref<1x1x32xf32, #tpu.memory_space<vmem>>, vector<1x1x32xf32>
    %143 = vector.shape_cast %142 : vector<1x1x32xf32> to vector<1x32xf32>
    %144 = vector.broadcast %143 : vector<1x32xf32> to vector<16x32xf32>
    %145 = arith.addf %141, %144 : vector<16x32xf32>
    %c0_46 = arith.constant 0 : index
    %c0_47 = arith.constant 0 : index
    %c0_48 = arith.constant 0 : index
    %146 = vector.load %arg7[%c0_46, %c0_47, %c0_48] : memref<1x32x2048xbf16, #tpu.memory_space<vmem>>, vector<1x32x512xbf16>
    %147 = vector.shape_cast %146 : vector<1x32x512xbf16> to vector<32x512xbf16>
    %cst_49 = arith.constant dense<0.000000e+00> : vector<16x512xf32>
    %148 = tpu.matmul %140, %147, %cst_49 {dimension_numbers = #tpu.dot_dimension_numbers<[1], [0], [0], [1], [0, 0, 1, 1], [], []>} : vector<16x32xbf16>, vector<32x512xbf16>, vector<16x512xf32> -> vector<16x512xf32>
    %c0_50 = arith.constant 0 : index
    %c0_51 = arith.constant 0 : index
    %c0_52 = arith.constant 0 : index
    %149 = vector.load %arg8[%c0_50, %c0_51, %c0_52] : memref<1x1x2048xf32, #tpu.memory_space<vmem>>, vector<1x1x512xf32>
    %150 = vector.shape_cast %149 : vector<1x1x512xf32> to vector<1x512xf32>
    %151 = vector.broadcast %150 : vector<1x512xf32> to vector<16x512xf32>
    %152 = arith.addf %148, %151 : vector<16x512xf32>
    %153 = arith.truncf %152 : vector<16x512xf32> to vector<16x512xbf16>
    %cst_53 = arith.constant 0.000000e+00 : bf16
    %154 = vector.broadcast %cst_53 : bf16 to vector<16x512xbf16>
    %155 = arith.maximumf %153, %154 : vector<16x512xbf16>
    %c0_54 = arith.constant 0 : index
    %c0_55 = arith.constant 0 : index
    %c0_56 = arith.constant 0 : index
    %156 = vector.load %arg9[%c0_54, %c0_55, %c0_56] : memref<1x2048x32xbf16, #tpu.memory_space<vmem>>, vector<1x512x32xbf16>
    %157 = vector.shape_cast %156 : vector<1x512x32xbf16> to vector<512x32xbf16>
    %cst_57 = arith.constant dense<0.000000e+00> : vector<16x32xf32>
    %158 = tpu.matmul %155, %157, %cst_57 {dimension_numbers = #tpu.dot_dimension_numbers<[1], [0], [0], [1], [0, 0, 1, 1], [], []>} : vector<16x512xbf16>, vector<512x32xbf16>, vector<16x32xf32> -> vector<16x32xf32>
    %159 = arith.addf %145, %158 : vector<16x32xf32>
    %c0_58 = arith.constant 0 : index
    %c0_59 = arith.constant 0 : index
    %c512 = arith.constant 512 : index
    %160 = vector.load %arg7[%c0_58, %c0_59, %c512] : memref<1x32x2048xbf16, #tpu.memory_space<vmem>>, vector<1x32x512xbf16>
    %161 = vector.shape_cast %160 : vector<1x32x512xbf16> to vector<32x512xbf16>
    %cst_60 = arith.constant dense<0.000000e+00> : vector<16x512xf32>
    %162 = tpu.matmul %140, %161, %cst_60 {dimension_numbers = #tpu.dot_dimension_numbers<[1], [0], [0], [1], [0, 0, 1, 1], [], []>} : vector<16x32xbf16>, vector<32x512xbf16>, vector<16x512xf32> -> vector<16x512xf32>
    %c0_61 = arith.constant 0 : index
    %c0_62 = arith.constant 0 : index
    %c512_63 = arith.constant 512 : index
    %163 = vector.load %arg8[%c0_61, %c0_62, %c512_63] : memref<1x1x2048xf32, #tpu.memory_space<vmem>>, vector<1x1x512xf32>
    %164 = vector.shape_cast %163 : vector<1x1x512xf32> to vector<1x512xf32>
    %165 = vector.broadcast %164 : vector<1x512xf32> to vector<16x512xf32>
    %166 = arith.addf %162, %165 : vector<16x512xf32>
    %167 = arith.truncf %166 : vector<16x512xf32> to vector<16x512xbf16>
    %cst_64 = arith.constant 0.000000e+00 : bf16
    %168 = vector.broadcast %cst_64 : bf16 to vector<16x512xbf16>
    %169 = arith.maximumf %167, %168 : vector<16x512xbf16>
    %c0_65 = arith.constant 0 : index
    %c512_66 = arith.constant 512 : index
    %c0_67 = arith.constant 0 : index
    %170 = vector.load %arg9[%c0_65, %c512_66, %c0_67] : memref<1x2048x32xbf16, #tpu.memory_space<vmem>>, vector<1x512x32xbf16>
    %171 = vector.shape_cast %170 : vector<1x512x32xbf16> to vector<512x32xbf16>
    %cst_68 = arith.constant dense<0.000000e+00> : vector<16x32xf32>
    %172 = tpu.matmul %169, %171, %cst_68 {dimension_numbers = #tpu.dot_dimension_numbers<[1], [0], [0], [1], [0, 0, 1, 1], [], []>} : vector<16x512xbf16>, vector<512x32xbf16>, vector<16x32xf32> -> vector<16x32xf32>
    %173 = arith.addf %159, %172 : vector<16x32xf32>
    %c0_69 = arith.constant 0 : index
    %c0_70 = arith.constant 0 : index
    %c1024 = arith.constant 1024 : index
    %174 = vector.load %arg7[%c0_69, %c0_70, %c1024] : memref<1x32x2048xbf16, #tpu.memory_space<vmem>>, vector<1x32x512xbf16>
    %175 = vector.shape_cast %174 : vector<1x32x512xbf16> to vector<32x512xbf16>
    %cst_71 = arith.constant dense<0.000000e+00> : vector<16x512xf32>
    %176 = tpu.matmul %140, %175, %cst_71 {dimension_numbers = #tpu.dot_dimension_numbers<[1], [0], [0], [1], [0, 0, 1, 1], [], []>} : vector<16x32xbf16>, vector<32x512xbf16>, vector<16x512xf32> -> vector<16x512xf32>
    %c0_72 = arith.constant 0 : index
    %c0_73 = arith.constant 0 : index
    %c1024_74 = arith.constant 1024 : index
    %177 = vector.load %arg8[%c0_72, %c0_73, %c1024_74] : memref<1x1x2048xf32, #tpu.memory_space<vmem>>, vector<1x1x512xf32>
    %178 = vector.shape_cast %177 : vector<1x1x512xf32> to vector<1x512xf32>
    %179 = vector.broadcast %178 : vector<1x512xf32> to vector<16x512xf32>
    %180 = arith.addf %176, %179 : vector<16x512xf32>
    %181 = arith.truncf %180 : vector<16x512xf32> to vector<16x512xbf16>
    %cst_75 = arith.constant 0.000000e+00 : bf16
    %182 = vector.broadcast %cst_75 : bf16 to vector<16x512xbf16>
    %183 = arith.maximumf %181, %182 : vector<16x512xbf16>
    %c0_76 = arith.constant 0 : index
    %c1024_77 = arith.constant 1024 : index
    %c0_78 = arith.constant 0 : index
    %184 = vector.load %arg9[%c0_76, %c1024_77, %c0_78] : memref<1x2048x32xbf16, #tpu.memory_space<vmem>>, vector<1x512x32xbf16>
    %185 = vector.shape_cast %184 : vector<1x512x32xbf16> to vector<512x32xbf16>
    %cst_79 = arith.constant dense<0.000000e+00> : vector<16x32xf32>
    %186 = tpu.matmul %183, %185, %cst_79 {dimension_numbers = #tpu.dot_dimension_numbers<[1], [0], [0], [1], [0, 0, 1, 1], [], []>} : vector<16x512xbf16>, vector<512x32xbf16>, vector<16x32xf32> -> vector<16x32xf32>
    %187 = arith.addf %173, %186 : vector<16x32xf32>
    %c0_80 = arith.constant 0 : index
    %c0_81 = arith.constant 0 : index
    %c1536 = arith.constant 1536 : index
    %188 = vector.load %arg7[%c0_80, %c0_81, %c1536] : memref<1x32x2048xbf16, #tpu.memory_space<vmem>>, vector<1x32x512xbf16>
    %189 = vector.shape_cast %188 : vector<1x32x512xbf16> to vector<32x512xbf16>
    %cst_82 = arith.constant dense<0.000000e+00> : vector<16x512xf32>
    %190 = tpu.matmul %140, %189, %cst_82 {dimension_numbers = #tpu.dot_dimension_numbers<[1], [0], [0], [1], [0, 0, 1, 1], [], []>} : vector<16x32xbf16>, vector<32x512xbf16>, vector<16x512xf32> -> vector<16x512xf32>
    %c0_83 = arith.constant 0 : index
    %c0_84 = arith.constant 0 : index
    %c1536_85 = arith.constant 1536 : index
    %191 = vector.load %arg8[%c0_83, %c0_84, %c1536_85] : memref<1x1x2048xf32, #tpu.memory_space<vmem>>, vector<1x1x512xf32>
    %192 = vector.shape_cast %191 : vector<1x1x512xf32> to vector<1x512xf32>
    %193 = vector.broadcast %192 : vector<1x512xf32> to vector<16x512xf32>
    %194 = arith.addf %190, %193 : vector<16x512xf32>
    %195 = arith.truncf %194 : vector<16x512xf32> to vector<16x512xbf16>
    %cst_86 = arith.constant 0.000000e+00 : bf16
    %196 = vector.broadcast %cst_86 : bf16 to vector<16x512xbf16>
    %197 = arith.maximumf %195, %196 : vector<16x512xbf16>
    %c0_87 = arith.constant 0 : index
    %c1536_88 = arith.constant 1536 : index
    %c0_89 = arith.constant 0 : index
    %198 = vector.load %arg9[%c0_87, %c1536_88, %c0_89] : memref<1x2048x32xbf16, #tpu.memory_space<vmem>>, vector<1x512x32xbf16>
    %199 = vector.shape_cast %198 : vector<1x512x32xbf16> to vector<512x32xbf16>
    %cst_90 = arith.constant dense<0.000000e+00> : vector<16x32xf32>
    %200 = tpu.matmul %197, %199, %cst_90 {dimension_numbers = #tpu.dot_dimension_numbers<[1], [0], [0], [1], [0, 0, 1, 1], [], []>} : vector<16x512xbf16>, vector<512x32xbf16>, vector<16x32xf32> -> vector<16x32xf32>
    %201 = arith.addf %187, %200 : vector<16x32xf32>
    %202 = arith.addf %139, %201 : vector<16x32xf32>
    %c0_91 = arith.constant 0 : index
    %c0_92 = arith.constant 0 : index
    %c0_93 = arith.constant 0 : index
    %203 = vector.load %arg13[%c0_91, %c0_92, %c0_93] : memref<1x1x32xf32, #tpu.memory_space<vmem>>, vector<1x1x32xf32>
    %204 = vector.shape_cast %203 : vector<1x1x32xf32> to vector<1x32xf32>
    %c0_94 = arith.constant 0 : index
    %c0_95 = arith.constant 0 : index
    %c0_96 = arith.constant 0 : index
    %205 = vector.load %arg14[%c0_94, %c0_95, %c0_96] : memref<1x1x32xf32, #tpu.memory_space<vmem>>, vector<1x1x32xf32>
    %206 = vector.shape_cast %205 : vector<1x1x32xf32> to vector<1x32xf32>
    %cst_97 = arith.constant dense<0.000000e+00> : vector<16xf32>
    %207 = vector.multi_reduction <add>, %202, %cst_97 [1] : vector<16x32xf32> to vector<16xf32>
    %208 = vector.shape_cast %207 : vector<16xf32> to vector<16x1xf32>
    %cst_98 = arith.constant 3.200000e+01 : f32
    %209 = vector.broadcast %cst_98 : f32 to vector<16x1xf32>
    %210 = arith.divf %208, %209 : vector<16x1xf32>
    %211 = vector.broadcast %210 : vector<16x1xf32> to vector<16x32xf32>
    %212 = arith.subf %202, %211 : vector<16x32xf32>
    %213 = arith.mulf %212, %212 : vector<16x32xf32>
    %cst_99 = arith.constant dense<0.000000e+00> : vector<16xf32>
    %214 = vector.multi_reduction <add>, %213, %cst_99 [1] : vector<16x32xf32> to vector<16xf32>
    %215 = vector.shape_cast %214 : vector<16xf32> to vector<16x1xf32>
    %cst_100 = arith.constant 3.200000e+01 : f32
    %216 = vector.broadcast %cst_100 : f32 to vector<16x1xf32>
    %217 = arith.divf %215, %216 : vector<16x1xf32>
    %218 = vector.broadcast %210 : vector<16x1xf32> to vector<16x32xf32>
    %219 = arith.subf %202, %218 : vector<16x32xf32>
    %cst_101 = arith.constant 9.99999974E-6 : f32
    %220 = vector.broadcast %cst_101 : f32 to vector<16x1xf32>
    %221 = arith.addf %217, %220 : vector<16x1xf32>
    %222 = math.rsqrt %221 : vector<16x1xf32>
    %223 = vector.broadcast %222 : vector<16x1xf32> to vector<16x32xf32>
    %224 = arith.mulf %219, %223 : vector<16x32xf32>
    %225 = vector.broadcast %204 : vector<1x32xf32> to vector<16x32xf32>
    %226 = arith.mulf %224, %225 : vector<16x32xf32>
    %227 = vector.broadcast %206 : vector<1x32xf32> to vector<16x32xf32>
    %228 = arith.addf %226, %227 : vector<16x32xf32>
    %c0_102 = arith.constant 0 : index
    %c0_103 = arith.constant 0 : index
    %229 = vector.load %arg16[%c0_102, %c0_103] : memref<16x32xf32, #tpu.memory_space<vmem>>, vector<16x32xf32>
    tpu.vector_store %arg16[%c0_102, %c0_103], %228 {strides = array<i32>} : memref<16x32xf32, #tpu.memory_space<vmem>>, vector<16x32xf32>,
    %230 = vector.shape_cast %228 : vector<16x32xf32> to vector<2x8x32xf32>
    %c0_104 = arith.constant 0 : index
    %c0_105 = arith.constant 0 : index
    %c0_106 = arith.constant 0 : index
    %231 = vector.load %arg15[%c0_104, %c0_105, %c0_106] : memref<2x8x32xf32, #tpu.memory_space<vmem>>, vector<2x8x32xf32>
    tpu.vector_store %arg15[%c0_104, %c0_105, %c0_106], %230 {strides = array<i32>} : memref<2x8x32xf32, #tpu.memory_space<vmem>>, vector<2x8x32xf32>,
    return
  }
  func.func @transform_0(%arg0: i32, %arg1: i32) -> (i32, i32, i32) {
    %c0_i32 = arith.constant 0 : i32
    %c0_i32_0 = arith.constant 0 : i32
    %c0_i32_1 = arith.constant 0 : i32
    return %arg0, %c0_i32, %c0_i32_0 : i32, i32, i32
  }
  func.func @transform_1(%arg0: i32, %arg1: i32) -> (i32, i32, i32) {
    %c0_i32 = arith.constant 0 : i32
    %c0_i32_0 = arith.constant 0 : i32
    %c0_i32_1 = arith.constant 0 : i32
    return %arg1, %c0_i32, %c0_i32_0 : i32, i32, i32
  }
  func.func @transform_2(%arg0: i32, %arg1: i32) -> (i32, i32, i32) {
    %c0_i32 = arith.constant 0 : i32
    %c0_i32_0 = arith.constant 0 : i32
    %c0_i32_1 = arith.constant 0 : i32
    return %arg1, %c0_i32, %c0_i32_0 : i32, i32, i32
  }
  func.func @transform_3(%arg0: i32, %arg1: i32) -> (i32, i32, i32) {
    %c0_i32 = arith.constant 0 : i32
    %c0_i32_0 = arith.constant 0 : i32
    %c0_i32_1 = arith.constant 0 : i32
    return %arg1, %c0_i32, %c0_i32_0 : i32, i32, i32
  }
  func.func @transform_4(%arg0: i32, %arg1: i32) -> (i32, i32, i32) {
    %c0_i32 = arith.constant 0 : i32
    %c0_i32_0 = arith.constant 0 : i32
    %c0_i32_1 = arith.constant 0 : i32
    return %arg1, %c0_i32, %c0_i32_0 : i32, i32, i32
  }
  func.func @transform_5(%arg0: i32, %arg1: i32) -> (i32, i32, i32) {
    %c0_i32 = arith.constant 0 : i32
    %c0_i32_0 = arith.constant 0 : i32
    %c0_i32_1 = arith.constant 0 : i32
    return %arg1, %c0_i32, %c0_i32_0 : i32, i32, i32
  }
  func.func @transform_6(%arg0: i32, %arg1: i32) -> (i32, i32, i32) {
    %c0_i32 = arith.constant 0 : i32
    %c0_i32_0 = arith.constant 0 : i32
    %c0_i32_1 = arith.constant 0 : i32
    return %arg1, %c0_i32, %c0_i32_0 : i32, i32, i32
  }
  func.func @transform_7(%arg0: i32, %arg1: i32) -> (i32, i32, i32) {
    %c0_i32 = arith.constant 0 : i32
    %c0_i32_0 = arith.constant 0 : i32
    %c0_i32_1 = arith.constant 0 : i32
    return %arg1, %c0_i32, %c0_i32_0 : i32, i32, i32
  }
  func.func @transform_8(%arg0: i32, %arg1: i32) -> (i32, i32, i32) {
    %c0_i32 = arith.constant 0 : i32
    %c0_i32_0 = arith.constant 0 : i32
    %c0_i32_1 = arith.constant 0 : i32
    return %arg1, %c0_i32, %c0_i32_0 : i32, i32, i32
  }
  func.func @transform_9(%arg0: i32, %arg1: i32) -> (i32, i32, i32) {
    %c0_i32 = arith.constant 0 : i32
    %c0_i32_0 = arith.constant 0 : i32
    %c0_i32_1 = arith.constant 0 : i32
    return %arg1, %c0_i32, %c0_i32_0 : i32, i32, i32
  }
  func.func @transform_10(%arg0: i32, %arg1: i32) -> (i32, i32, i32) {
    %c0_i32 = arith.constant 0 : i32
    %c0_i32_0 = arith.constant 0 : i32
    %c0_i32_1 = arith.constant 0 : i32
    return %arg1, %c0_i32, %c0_i32_0 : i32, i32, i32
  }
  func.func @transform_11(%arg0: i32, %arg1: i32) -> (i32, i32, i32) {
    %c0_i32 = arith.constant 0 : i32
    %c0_i32_0 = arith.constant 0 : i32
    %c0_i32_1 = arith.constant 0 : i32
    return %arg1, %c0_i32, %c0_i32_0 : i32, i32, i32
  }
  func.func @transform_12(%arg0: i32, %arg1: i32) -> (i32, i32, i32) {
    %c0_i32 = arith.constant 0 : i32
    %c0_i32_0 = arith.constant 0 : i32
    %c0_i32_1 = arith.constant 0 : i32
    return %arg1, %c0_i32, %c0_i32_0 : i32, i32, i32
  }
  func.func @transform_13(%arg0: i32, %arg1: i32) -> (i32, i32, i32) {
    %c0_i32 = arith.constant 0 : i32
    %c0_i32_0 = arith.constant 0 : i32
    %c0_i32_1 = arith.constant 0 : i32
    return %arg0, %c0_i32, %c0_i32_0 : i32, i32, i32
  }
}

</mosaic_0001>

<bundles_post_ra>
// kernel: encoder_transformer.1
= control target key start
LH: loop header
LB: loop body
LE: loop exit
PB: predicated region body
PF: predicated region fallthrough
CT: control target
= control target key end

     0   :  { %s4914_s25 = smov 0   ;;  %s4916_s26 = smov 0   ;;  %s5479_s0 = inlined_call_operand.vmem [shape: f32[2,8,32], index: 0, kind: input, shape index: {}]   ;;  %s5480_s1 = inlined_call_operand.vmem [shape: bf16[2,32,96], index: 1, kind: input, shape index: {}]   ;;  %s5481_s2 = inlined_call_operand.vmem [shape: f32[2,1,96], index: 2, kind: input, shape index: {}]   ;;  %s5482_s3 = inlined_call_operand.vmem [shape: bf16[2,32,32], index: 3, kind: input, shape index: {}]   ;;  %s5483_s4 = inlined_call_operand.vmem [shape: f32[2,1,32], index: 4, kind: input, shape index: {}]   ;;  %s5484_s5 = inlined_call_operand.vmem [shape: bf16[2,32,2048], index: 5, kind: input, shape index: {}]   ;;  %s5485_s6 = inlined_call_operand.vmem [shape: f32[2,1,2048], index: 6, kind: input, shape index: {}]   ;;  %s5486_s7 = inlined_call_operand.vmem [shape: bf16[2,2048,32], index: 7, kind: input, shape index: {}]   ;;  %s5487_s8 = inlined_call_operand.vmem [shape: f32[2,1,32], index: 8, kind: input, shape index: {}]   ;;  %s5488_s9 = inlined_call_operand.vmem [shape: f32[2,1,32], index: 9, kind: input, shape index: {}]   ;;  %s5489_s10 = inlined_call_operand.vmem [shape: f32[2,1,32], index: 10, kind: input, shape index: {}]   ;;  %s5490_s11 = inlined_call_operand.vmem [shape: f32[2,1,32], index: 11, kind: input, shape index: {}]   ;;  %s5491_s12 = inlined_call_operand.vmem [shape: f32[2,1,32], index: 12, kind: input, shape index: {}]   ;;  %s5492_s13 = inlined_call_operand.vmem [shape: f32[2,8,32], index: 13, kind: output, shape index: {}]  }
   0x1   :  { %5497 = sst [smem:[#allocation6_spill]] %s5479_s0  ;;  %s4918_s27 = smov 0  }
   0x2   :  { %5498 = sst [smem:[#allocation7_spill]] %s5480_s1 }
   0x3   :  { %5499 = sst [smem:[#allocation8_spill]] %s5482_s3 }
   0x4   :  { %5500 = sst [smem:[#allocation9_spill]] %s5484_s5 }
   0x5   :  { %5501 = sst [smem:[#allocation10_spill]] %s5485_s6 }
   0x6   :  { %5502 = sst [smem:[#allocation11_spill]] %s5492_s13 }
   0x7 LB: > { %5503 = sst [smem:[#allocation3_spill]] %s4821_s26  ;;  %s32_s28 = sadd.s32 1, %s4821_s26  ;;  %s4825_s27 = sphi %s4918_s27, %s23_s27   ;;  %s4821_s26 = sphi %s4916_s26, %s5517_s26   ;;  %s4817_s25 = sphi %s4914_s25, %s5516_s25  }
   0x8   : > { %5504 = sst [smem:[#allocation4_spill]] %s4825_s27  ;;  %p4031_p0 = scmp.ge.s32.totalorder %s4825_s27, 1 }
   0x9   : > { %p33_p1 = scmp.ge.s32.totalorder %s32_s28, 2  ;;  %p505_p2 = scmp.lt.s32.totalorder %s4825_s27, 3 }
   0xb   : > { %s5519_s28 = smov (%p33_p1, %s32_s28), 0  ;;  %p506_p3 = pnand %p4031_p0, %p505_p2 }
   0xc   : > { %5505 = sst [smem:[#allocation5_spill]] %s5519_s28  ;;  %p600_p4 = scmp.lt.s32.totalorder (!%p506_p3), %s4817_s25, 1 }
   0xd   : > { %509 = sbr.rel (%p506_p3) target bundleno = 4841 (0x12e9), region = 72  ;;  %s5506_s1 = sld [smem:[#allocation7_spill]] (!%p506_p3) }
   0xe   : > { %s5507_s3 = sld [smem:[#allocation8_spill]] (!%p506_p3)  ;;  %s5508_s5 = sld [smem:[#allocation9_spill]] (!%p506_p3) }
   0xf   : > { %s5509_s6 = sld [smem:[#allocation10_spill]] (!%p506_p3)  ;;  %p4041_p5 = scmp.ne.s32.totalorder (!%p506_p3), %s4817_s25, 0 }
  0x14   : > { %s4932_s29 = scalar_select %p600_p4, %s4817_s25, 1 }
  0x15   : > { %vm658_vm0 = vcmask (!%p4041_p5), 261120  }
  0x16   : > { %s4243_s30 = sshll.u32 %s4932_s29, 4  ;;  %s4245_s26 = sshll.u32 %s4932_s29, 8 }
  0x17   : > { %s604_s19 = scalar_lea.vmem %s5506_s1, %s4243_s30  ;;  %s4945_s22 = scalar_lea.vmem %s5507_s3, %s4243_s30 }
  0x18   : > { %s4955_s0 = scalar_lea.vmem %s5508_s5, %s4245_s26  ;;  %s4960_s17 = scalar_lea.vmem %s5509_s6, %s4243_s30 }
  0x19   : > { %s4246_s18 = sshll.u32 %s4932_s29, 10  ;;  %s632_s21 = scalar_lea.vmem %s5487_s8, %s4932_s29 }
  0x1a   : > { %s4970_s23 = scalar_lea.vmem %s5486_s7, %s4246_s18  ;;  %s635_s13 = scalar_lea.vmem %s5488_s9, %s4932_s29 }
  0x1b   : > { %s638_s14 = scalar_lea.vmem %s5489_s10, %s4932_s29  ;;  %s641_s5 = scalar_lea.vmem %s5490_s11, %s4932_s29 }
  0x1c   : > { %s644_s20 = scalar_lea.vmem %s5491_s12, %s4932_s29  ;;  %655 = sbr.rel (%p4041_p5) target bundleno = 37 (0x25), region = 76 }
  0x1d   : > { %s5510_s18 = sld [smem:[#allocation6_spill]] (!%p4041_p5) }
  0x23   : > { %v656_v0 = vld [vmem:[%s5510_s18] sm:$0xff]  ;;  %v657_v1 = vld [vmem:[%s5510_s18 + $0x8] sm:$0xff] }
  0x24   : > { %659 = vst.msk [vmem:[#allocation2] sm:$0xff] %vm658_vm0, %v656_v0  ;;  %660 = vst.msk [vmem:[#allocation2 + $0x8] sm:$0xff] %vm658_vm0, %v657_v1 }
  0x25 PF: > { %v4629_v2 = vld [vmem:[%s604_s19] sm:$0xff]   ;;  %v4827_v3 = vmov 0.0   ;;  %v4630_v4 = vld [vmem:[%s604_s19 + $0x8] sm:$0xff]   ;;  %vm4828_vm1 = vmmov 0   ;;  %vm687_vm2 = vcmask 261120   ;;  %s5511_s19 = scalar_lea.vmem %s5481_s2, %s4932_s29  ;;  %s4829_s26 = smov 96  }
  0x26   : > { %4461 = vmatprep.subr.bf16.mxu0 %v4827_v3  ;;  %4469 = vmatprep.subr.bf16.mxu1 %v4827_v3  ;;  %v4042_v8 = vld [vmem:[%s5511_s19] ss:$0 sm:$0xff]  ;;  %vm737_vm3 = vcmask 64512   ;;  %s4830_s27 = smov 64   ;;  %s4831_s30 = smov 88   ;;  %vm862_vm4 = vcmask 1043456  }
  0x27   : > { %4462 = vmatpush3.bf16.msra.mxu0 %v4629_v2  ;;  %4465 = vmatprep.mubr.msk.bf16.mxu0 %vm4828_vm1, %v4827_v3  ;;  %s4832_s15 = smov 120   ;;  %s4833_s16 = smov 56   ;;  %vm1640_vm5 = vcmask 130048   ;;  %vm1643_vm6 = vcmask 195584  }
  0x28   : > { %4463 = vmatprep.subr.bf16.mxu0 %v4827_v3  ;;  %4471 = vmatprep.mubr.msk.bf16.mxu1 %vm4828_vm1, %v4827_v3  ;;  %s4834_s1 = smov 80   ;;  %s4835_s3 = smov 112  }
  0x29   : > { %s4836_s28 = smov 48   ;;  %s4837_s24 = smov 72  }
  0x2a   : > { %s4838_s6 = smov 104   ;;  %s4839_s25 = smov 40  }
  0x2b   : > { %v661_v5 = vld [vmem:[#allocation2] sm:$0xff]  ;;  %v662_v6 = vld [vmem:[#allocation2 + $0x8] sm:$0xff]  ;;  %4464 = vmatpush3.bf16.msra.mxu0 %v4630_v4  ;;  %s4840_s19 = smov 8  }
  0x2c   : > { %v663_v7 = vpack.c.bf16 %v662_v6, %v661_v5  ;;  %4475 = vmatprep.subr.bf16.mxu0 %v4827_v3 }
  0x2e   : > { %4466 = vmatmul.mubr.msk.bf16.vlgmr.msra.gmra.mrb[0].mxu0 %vm687_vm2, %v663_v7 }
  0x2f   : > { %4477 = vmatprep.mubr.msk.bf16.mxu0 %vm4828_vm1, %v4827_v3 }
 0x101   : > { %v725_v9 = vpop.f32.mrb[0].mxu0 }
 0x102   : > { %v726_v10 = vadd.f32 %v4042_v8, %v725_v9  ;;  %v4467_v11 = vpop.f32.mrb[1].mxu0 }
 0x103   : > { %v728_v12 = vpop.f32.mrb[2].mxu0 }
 0x104   : > { %v5010_v13 = vpack.c.bf16 %v726_v10, %v726_v10  ;;  %v729_v14 = vadd.f32 %v4042_v8, %v728_v12  ;;  %v4468_v15 = vpop.f32.mrb[3].mxu0 }
 0x106   : > { %735 = vrot.lane.b32.xlu0 %v5010_v13, %s4829_s26  ;;  %v5013_v16 = vpack.c.bf16 %v729_v14, %v729_v14 }
 0x10a   : > { %785 = vrot.lane.b32.xlu0 %v5013_v16, %s4829_s26  ;;  %s4841_s26 = smov 16  }
 0x178   : > { %v736_v17 = vpop.permute.xlu0 %735 }
 0x179   : > { %v742_v18 = vsel %vm737_vm3, %v736_v17, 0 }
 0x17a   : > { %4470 = vmatpush3.bf16.xpose.msra.mxu1 %v742_v18 }
 0x17b   : > { %4481 = vmatprep.subr.bf16.mxu1 %v4827_v3 }
 0x17c   : > { %v786_v19 = vpop.permute.xlu0 %785 }
 0x17d   : > { %v791_v20 = vsel %vm737_vm3, %v786_v19, 0 }
 0x17e   : > { %4476 = vmatpush3.bf16.xpose.msra.mxu0 %v791_v20 }
 0x17f   : > { %4487 = vmatprep.subr.bf16.mxu0 %v4827_v3 }
 0x181   : > { %4472 = vmatmul.mubr.msk.bf16.vlgmr.msra.gmra.mrb[0].mxu1 %vm737_vm3, %v5010_v13 }
 0x182   : > { %4483 = vmatprep.mubr.msk.bf16.mxu1 %vm4828_vm1, %v4827_v3 }
 0x185   : > { %4478 = vmatmul.mubr.msk.bf16.vlgmr.msra.gmra.mrb[4].mxu0 %vm737_vm3, %v5013_v16 }
 0x186   : > { %4489 = vmatprep.mubr.msk.bf16.mxu0 %vm4828_vm1, %v4827_v3 }
 0x254   : > { %v778_v21 = vpop.f32.mrb[0].mxu1 }
 0x255   : > { %v4473_v22 = vpop.f32.mrb[1].mxu1  ;;  %v833_v23 = vsel %vm737_vm3, %v778_v21, -inf }
 0x256   : > { %834 = vmax.xlane.f32.xlu1 %v833_v23  ;;  %v781_v24 = vpop.f32.mrb[2].mxu1 }
 0x257   : > { %v4474_v25 = vpop.f32.mrb[3].mxu1 }
 0x258   : > { %v827_v26 = vpop.f32.mrb[4].mxu0 }
 0x259   : > { %v4479_v27 = vpop.f32.mrb[5].mxu0  ;;  %v836_v28 = vsel %vm737_vm3, %v827_v26, -inf }
 0x25a   : > { %837 = vmax.xlane.f32.xlu1 %v836_v28  ;;  %v830_v29 = vpop.f32.mrb[6].mxu0 }
 0x25b   : > { %v4480_v30 = vpop.f32.mrb[7].mxu0 }
 0x26b   : > { %857 = vrot.lane.b32.xlu1 %v5010_v13, %s4830_s27 }
 0x26f   : > { %906 = vrot.lane.b32.xlu1 %v5013_v16, %s4830_s27  ;;  %s4842_s27 = smov 24  }
 0x273   : > { %956 = vrot.lane.b32.xlu1 %v5010_v13, %s4831_s30 }
 0x2e3   : > { %v835_v31 = vpop.xlane.xlu1 %834 }
 0x2e4   : > { %v839_v32 = vsub.f32 %v778_v21, %v835_v31 }
 0x2e6   : > { %v841_v33 = vmul.f32 1.442695, %v839_v32 }
 0x2e7   : > { %v838_v34 = vpop.xlane.xlu1 %837 }
 0x2e8   : > { %4761 = vpow2.f32 %v841_v33  ;;  %v840_v35 = vsub.f32 %v827_v26, %v838_v34 }
 0x2ea   : > { %v843_v36 = vmul.f32 1.442695, %v840_v35 }
 0x2eb   : > { %v858_v37 = vpop.permute.xlu1 %857 }
 0x2ec   : > { %4763 = vpow2.f32 %v843_v36  ;;  %v864_v38 = vsel %vm862_vm4, %v858_v37, 0 }
 0x2ed   : > { %4482 = vmatpush3.bf16.msra.mxu1 %v864_v38 }
 0x2ee   : > { %4493 = vmatprep.subr.bf16.mxu1 %v4827_v3 }
 0x2ef   : > { %v907_v39 = vpop.permute.xlu1 %906 }
 0x2f0   : > { %v912_v40 = vsel %vm862_vm4, %v907_v39, 0 }
 0x2f1   : > { %4488 = vmatpush3.bf16.msra.mxu0 %v912_v40 }
 0x2f2   : > { %v4762_v41 = vpop.eup %4761  ;;  %4499 = vmatprep.subr.bf16.mxu0 %v4827_v3 }
 0x2f3   : > { %v845_v42 = vsel %vm737_vm3, %v4762_v41, 0.0  ;;  %v957_v45 = vpop.permute.xlu1 %956 }
 0x2f4   : > { %846 = vadd.xlane.f32.xlu0 %v845_v42  ;;  %v962_v52 = vsel %vm737_vm3, %v957_v45, 0 }
 0x2f6   : > { %v4764_v43 = vpop.eup %4763 }
 0x2f7   : > { %v848_v44 = vsel %vm737_vm3, %v4764_v43, 0.0 }
 0x2f8   : > { %849 = vadd.xlane.f32.xlu1 %v848_v44 }
 0x309   : > { %1006 = vrot.lane.b32.xlu1 %v5013_v16, %s4831_s30 }
 0x30a   : > { %954 = vrot.lane.b32.xlu0 %v5010_v13, %s4832_s15 }
 0x30d   : > { %1004 = vrot.lane.b32.xlu1 %v5013_v16, %s4832_s15  ;;  %s5512_s15 = scalar_lea.vmem %s5483_s4, %s4932_s29 }
 0x381   : > { %v847_v46 = vpop.xlane.xlu0 %846 }
 0x382   : > { %4765 = vrcp.f32 %v847_v46 }
 0x385   : > { %v850_v47 = vpop.xlane.xlu1 %849  ;;  %v955_v57 = vpop.permute.xlu0 %954 }
 0x386   : > { %4767 = vrcp.f32 %v850_v47 }
 0x389   : > { %v1007_v54 = vpop.permute.xlu1 %1006 }
 0x38a   : > { %v1012_v56 = vsel %vm737_vm3, %v1007_v54, 0 }
 0x38c   : > { %v4766_v48 = vpop.eup %4765 }
 0x38d   : > { %v853_v49 = vmul.f32 %v4766_v48, %v4762_v41  ;;  %v1005_v58 = vpop.permute.xlu1 %1004 }
 0x38f   : > { %v855_v50 = vpack.c.bf16 %v853_v49, %v853_v49 }
 0x390   : > { %v4768_v51 = vpop.eup %4767 }
 0x391   : > { %v854_v53 = vmul.f32 %v4768_v51, %v4764_v43  ;;  %4484 = vmatmul.mubr.msk.bf16.vlgmr.msra.gmra.mrb[4].mxu1 %vm737_vm3, %v855_v50 }
 0x392   : > { %4494 = vmatpush3.bf16.xpose.msra.mxu1 %v962_v52  ;;  %4495 = vmatprep.mubr.msk.bf16.mxu1 %vm4828_vm1, %v4827_v3 }
 0x393   : > { %v856_v55 = vpack.c.bf16 %v854_v53, %v854_v53  ;;  %4505 = vmatprep.subr.bf16.mxu1 %v4827_v3 }
 0x395   : > { %4490 = vmatmul.mubr.msk.bf16.vlgmr.msra.gmra.mrb[8].mxu0 %vm737_vm3, %v856_v55 }
 0x396   : > { %4500 = vmatpush3.bf16.xpose.msra.mxu0 %v1012_v56  ;;  %4501 = vmatprep.mubr.msk.bf16.mxu0 %vm4828_vm1, %v4827_v3 }
 0x397   : > { %4511 = vmatprep.subr.bf16.mxu0 %v4827_v3 }
 0x399   : > { %4496 = vmatmul.mubr.msk.bf16.vlgmr.msra.gmra.mrb[8].mxu1 %vm737_vm3, %v955_v57 }
 0x39a   : > { %4507 = vmatprep.mubr.msk.bf16.mxu1 %vm4828_vm1, %v4827_v3 }
 0x39d   : > { %4502 = vmatmul.mubr.msk.bf16.vlgmr.msra.gmra.mrb[12].mxu0 %vm737_vm3, %v1005_v58 }
 0x39e   : > { %4513 = vmatprep.mubr.msk.bf16.mxu0 %vm4828_vm1, %v4827_v3 }
 0x464   : > { %v5058_v59 = vpop.f32.mrb[4].mxu1 }
 0x465   : > { %v4485_v60 = vpop.f32.mrb[5].mxu1 }
 0x466   : > { %v903_v61 = vpop.f32.mrb[6].mxu1 }
 0x467   : > { %v4486_v62 = vpop.f32.mrb[7].mxu1 }
 0x468   : > { %v5060_v63 = vpop.f32.mrb[8].mxu0 }
 0x469   : > { %v4491_v0 = vpop.f32.mrb[9].mxu0 }
 0x46a   : > { %v951_v1 = vpop.f32.mrb[10].mxu0 }
 0x46b   : > { %v4492_v2 = vpop.f32.mrb[11].mxu0 }
 0x46c   : > { %v998_v4 = vpop.f32.mrb[8].mxu1 }
 0x46d   : > { %v4497_v5 = vpop.f32.mrb[9].mxu1  ;;  %v1054_v6 = vsel %vm737_vm3, %v998_v4, -inf }
 0x46e   : > { %1055 = vmax.xlane.f32.xlu1 %v1054_v6  ;;  %v1001_v7 = vpop.f32.mrb[10].mxu1 }
 0x46f   : > { %v4498_v8 = vpop.f32.mrb[11].mxu1 }
 0x470   : > { %v1048_v9 = vpop.f32.mrb[12].mxu0 }
 0x471   : > { %v4503_v10 = vpop.f32.mrb[13].mxu0  ;;  %v1057_v11 = vsel %vm737_vm3, %v1048_v9, -inf }
 0x472   : > { %1058 = vmax.xlane.f32.xlu0 %v1057_v11  ;;  %v1051_v12 = vpop.f32.mrb[14].mxu0 }
 0x473   : > { %v4504_v14 = vpop.f32.mrb[15].mxu0 }
 0x47f   : > { %1078 = vrot.lane.b32.xlu1 %v5010_v13, %s4833_s16 }
 0x483   : > { %1176 = vrot.lane.b32.xlu1 %v5010_v13, %s4834_s1 }
 0x488   : > { %1126 = vrot.lane.b32.xlu0 %v5013_v16, %s4833_s16 }
 0x48c   : > { %1174 = vrot.lane.b32.xlu0 %v5010_v13, %s4835_s3 }
 0x4fb   : > { %v1056_v15 = vpop.xlane.xlu1 %1055 }
 0x4fc   : > { %v1060_v17 = vsub.f32 %v998_v4, %v1056_v15 }
 0x4fe   : > { %v1062_v18 = vmul.f32 1.442695, %v1060_v17 }
 0x4ff   : > { %v1079_v19 = vpop.permute.xlu1 %1078  ;;  %v1059_v20 = vpop.xlane.xlu0 %1058 }
 0x500   : > { %4769 = vpow2.f32 %v1062_v18  ;;  %v1084_v21 = vsel %vm862_vm4, %v1079_v19, 0  ;;  %v1061_v22 = vsub.f32 %v1048_v9, %v1059_v20 }
 0x501   : > { %4506 = vmatpush3.bf16.msra.mxu1 %v1084_v21 }
 0x502   : > { %v1064_v23 = vmul.f32 1.442695, %v1061_v22  ;;  %4517 = vmatprep.subr.bf16.mxu1 %v4827_v3 }
 0x503   : > { %v1127_v24 = vpop.permute.xlu0 %1126  ;;  %v1177_v30 = vpop.permute.xlu1 %1176 }
 0x504   : > { %4771 = vpow2.f32 %v1064_v23  ;;  %v1132_v25 = vsel %vm862_vm4, %v1127_v24, 0  ;;  %v1182_v37 = vsel %vm737_vm3, %v1177_v30, 0 }
 0x505   : > { %4512 = vmatpush3.bf16.msra.mxu0 %v1132_v25 }
 0x506   : > { %4523 = vmatprep.subr.bf16.mxu0 %v4827_v3 }
 0x507   : > { %v1175_v42 = vpop.permute.xlu0 %1174 }
 0x50a   : > { %v4770_v26 = vpop.eup %4769 }
 0x50b   : > { %v1066_v27 = vsel %vm737_vm3, %v4770_v26, 0.0 }
 0x50c   : > { %1067 = vadd.xlane.f32.xlu1 %v1066_v27 }
 0x50e   : > { %v4772_v28 = vpop.eup %4771 }
 0x50f   : > { %v1069_v29 = vsel %vm737_vm3, %v4772_v28, 0.0 }
 0x510   : > { %1070 = vadd.xlane.f32.xlu1 %v1069_v29 }
 0x521   : > { %1226 = vrot.lane.b32.xlu1 %v5013_v16, %s4834_s1 }
 0x525   : > { %1224 = vrot.lane.b32.xlu1 %v5013_v16, %s4835_s3 }
 0x599   : > { %v1068_v31 = vpop.xlane.xlu1 %1067 }
 0x59a   : > { %4773 = vrcp.f32 %v1068_v31 }
 0x59d   : > { %v1071_v32 = vpop.xlane.xlu1 %1070 }
 0x59e   : > { %4775 = vrcp.f32 %v1071_v32 }
 0x5a1   : > { %v1227_v39 = vpop.permute.xlu1 %1226 }
 0x5a2   : > { %v1232_v41 = vsel %vm737_vm3, %v1227_v39, 0 }
 0x5a4   : > { %v4774_v33 = vpop.eup %4773 }
 0x5a5   : > { %v1074_v34 = vmul.f32 %v4774_v33, %v4770_v26  ;;  %v1225_v43 = vpop.permute.xlu1 %1224 }
 0x5a7   : > { %v1076_v35 = vpack.c.bf16 %v1074_v34, %v1074_v34 }
 0x5a8   : > { %v4776_v36 = vpop.eup %4775 }
 0x5a9   : > { %v1075_v38 = vmul.f32 %v4776_v36, %v4772_v28  ;;  %4508 = vmatmul.mubr.msk.bf16.vlgmr.msra.gmra.mrb[12].mxu1 %vm737_vm3, %v1076_v35 }
 0x5aa   : > { %4518 = vmatpush3.bf16.xpose.msra.mxu1 %v1182_v37  ;;  %4519 = vmatprep.mubr.msk.bf16.mxu1 %vm4828_vm1, %v4827_v3 }
 0x5ab   : > { %v1077_v40 = vpack.c.bf16 %v1075_v38, %v1075_v38  ;;  %4529 = vmatprep.subr.bf16.mxu1 %v4827_v3 }
 0x5ad   : > { %4514 = vmatmul.mubr.msk.bf16.vlgmr.msra.gmra.mrb[16].mxu0 %vm737_vm3, %v1077_v40 }
 0x5ae   : > { %4524 = vmatpush3.bf16.xpose.msra.mxu0 %v1232_v41  ;;  %4525 = vmatprep.mubr.msk.bf16.mxu0 %vm4828_vm1, %v4827_v3 }
 0x5af   : > { %4535 = vmatprep.subr.bf16.mxu0 %v4827_v3 }
 0x5b1   : > { %4520 = vmatmul.mubr.msk.bf16.vlgmr.msra.gmra.mrb[16].mxu1 %vm737_vm3, %v1175_v42 }
 0x5b2   : > { %4531 = vmatprep.mubr.msk.bf16.mxu1 %vm4828_vm1, %v4827_v3 }
 0x5b5   : > { %4526 = vmatmul.mubr.msk.bf16.vlgmr.msra.gmra.mrb[20].mxu0 %vm737_vm3, %v1225_v43 }
 0x5b6   : > { %4537 = vmatprep.mubr.msk.bf16.mxu0 %vm4828_vm1, %v4827_v3 }
 0x67c   : > { %v5092_v44 = vpop.f32.mrb[12].mxu1 }
 0x67d   : > { %v4509_v45 = vpop.f32.mrb[13].mxu1 }
 0x67e   : > { %v1123_v46 = vpop.f32.mrb[14].mxu1 }
 0x67f   : > { %v4510_v47 = vpop.f32.mrb[15].mxu1 }
 0x680   : > { %v5094_v48 = vpop.f32.mrb[16].mxu0 }
 0x681   : > { %v4614_v49 = vpack.i.bf16 %v5094_v48, %v5092_v44  ;;  %v4515_v50 = vpop.f32.mrb[17].mxu0 }
 0x682   : > { %v1171_v51 = vpop.f32.mrb[18].mxu0 }
 0x683   : > { %v4516_v52 = vpop.f32.mrb[19].mxu0 }
 0x684   : > { %v1218_v53 = vpop.f32.mrb[16].mxu1 }
 0x685   : > { %v4521_v54 = vpop.f32.mrb[17].mxu1  ;;  %v1274_v55 = vsel %vm737_vm3, %v1218_v53, -inf }
 0x686   : > { %1275 = vmax.xlane.f32.xlu0 %v1274_v55  ;;  %v1221_v56 = vpop.f32.mrb[18].mxu1 }
 0x687   : > { %v4522_v57 = vpop.f32.mrb[19].mxu1 }
 0x688   : > { %v1268_v58 = vpop.f32.mrb[20].mxu0 }
 0x689   : > { %v4527_v60 = vpop.f32.mrb[21].mxu0  ;;  %v1277_v61 = vsel %vm737_vm3, %v1268_v58, -inf }
 0x68a   : > { %1278 = vmax.xlane.f32.xlu1 %v1277_v61  ;;  %v1271_v62 = vpop.f32.mrb[22].mxu0 }
 0x68b   : > { %v4528_v0 = vpop.f32.mrb[23].mxu0 }
 0x69b   : > { %1298 = vrot.lane.b32.xlu1 %v5010_v13, %s4836_s28 }
 0x69f   : > { %1396 = vrot.lane.b32.xlu1 %v5010_v13, %s4837_s24 }
 0x6a3   : > { %1446 = vrot.lane.b32.xlu1 %v5013_v16, %s4837_s24 }
 0x6a7   : > { %1444 = vrot.lane.b32.xlu1 %v5013_v16, %s4838_s6 }
 0x713   : > { %v1276_v1 = vpop.xlane.xlu0 %1275 }
 0x714   : > { %v1280_v2 = vsub.f32 %v1218_v53, %v1276_v1 }
 0x716   : > { %v1282_v4 = vmul.f32 1.442695, %v1280_v2 }
 0x717   : > { %v1279_v5 = vpop.xlane.xlu1 %1278 }
 0x718   : > { %4777 = vpow2.f32 %v1282_v4  ;;  %v1281_v6 = vsub.f32 %v1268_v58, %v1279_v5 }
 0x71a   : > { %v1284_v7 = vmul.f32 1.442695, %v1281_v6 }
 0x71b   : > { %v1299_v8 = vpop.permute.xlu1 %1298 }
 0x71c   : > { %4779 = vpow2.f32 %v1284_v7  ;;  %v1304_v9 = vsel %vm862_vm4, %v1299_v8, 0 }
 0x71d   : > { %4530 = vmatpush3.bf16.msra.mxu1 %v1304_v9 }
 0x71e   : > { %4541 = vmatprep.subr.bf16.mxu1 %v4827_v3 }
 0x71f   : > { %v1397_v21 = vpop.permute.xlu1 %1396 }
 0x720   : > { %v1402_v25 = vsel %vm737_vm3, %v1397_v21, 0 }
 0x722   : > { %v4778_v10 = vpop.eup %4777 }
 0x723   : > { %v1286_v11 = vsel %vm737_vm3, %v4778_v10, 0.0  ;;  %v1447_v27 = vpop.permute.xlu1 %1446 }
 0x724   : > { %1287 = vadd.xlane.f32.xlu0 %v1286_v11  ;;  %v1452_v29 = vsel %vm737_vm3, %v1447_v27, 0  ;;  %v4632_v11 = vld [vmem:[%s4945_s22 + $0x8] sm:$0xff]  }
 0x726   : > { %v4780_v12 = vpop.eup %4779 }
 0x727   : > { %v1289_v14 = vsel %vm737_vm3, %v4780_v12, 0.0  ;;  %v1445_v31 = vpop.permute.xlu1 %1444 }
 0x728   : > { %1290 = vadd.xlane.f32.xlu0 %v1289_v14 }
 0x73e   : > { %1346 = vrot.lane.b32.xlu0 %v5013_v16, %s4836_s28 }
 0x742   : > { %1394 = vrot.lane.b32.xlu0 %v5010_v13, %s4838_s6 }
 0x7b1   : > { %v1288_v15 = vpop.xlane.xlu0 %1287 }
 0x7b2   : > { %4781 = vrcp.f32 %v1288_v15 }
 0x7b5   : > { %v1291_v17 = vpop.xlane.xlu0 %1290 }
 0x7b6   : > { %4783 = vrcp.f32 %v1291_v17 }
 0x7b9   : > { %v1347_v18 = vpop.permute.xlu0 %1346 }
 0x7ba   : > { %v1352_v19 = vsel %vm862_vm4, %v1347_v18, 0 }
 0x7bb   : > { %4536 = vmatpush3.bf16.msra.mxu0 %v1352_v19 }
 0x7bc   : > { %v4782_v20 = vpop.eup %4781  ;;  %4547 = vmatprep.subr.bf16.mxu0 %v4827_v3 }
 0x7bd   : > { %v1294_v22 = vmul.f32 %v4782_v20, %v4778_v10  ;;  %v1395_v30 = vpop.permute.xlu0 %1394  ;;  %v4631_v10 = vld [vmem:[%s4945_s22] sm:$0xff]  }
 0x7bf   : > { %v1296_v23 = vpack.c.bf16 %v1294_v22, %v1294_v22 }
 0x7c0   : > { %v4784_v24 = vpop.eup %4783 }
 0x7c1   : > { %v1295_v26 = vmul.f32 %v4784_v24, %v4780_v12  ;;  %4532 = vmatmul.mubr.msk.bf16.vlgmr.msra.gmra.mrb[20].mxu1 %vm737_vm3, %v1296_v23 }
 0x7c2   : > { %4542 = vmatpush3.bf16.xpose.msra.mxu1 %v1402_v25  ;;  %4543 = vmatprep.mubr.msk.bf16.mxu1 %vm4828_vm1, %v4827_v3 }
 0x7c3   : > { %v1297_v28 = vpack.c.bf16 %v1295_v26, %v1295_v26  ;;  %4553 = vmatprep.subr.bf16.mxu1 %v4827_v3 }
 0x7c5   : > { %4538 = vmatmul.mubr.msk.bf16.vlgmr.msra.gmra.mrb[24].mxu0 %vm737_vm3, %v1297_v28 }
 0x7c6   : > { %4548 = vmatpush3.bf16.xpose.msra.mxu0 %v1452_v29  ;;  %4549 = vmatprep.mubr.msk.bf16.mxu0 %vm4828_vm1, %v4827_v3 }
 0x7c7   : > { %4559 = vmatprep.subr.bf16.mxu0 %v4827_v3 }
 0x7c9   : > { %4544 = vmatmul.mubr.msk.bf16.vlgmr.msra.gmra.mrb[24].mxu1 %vm737_vm3, %v1395_v30 }
 0x7ca   : > { %4555 = vmatprep.mubr.msk.bf16.mxu1 %vm4828_vm1, %v4827_v3 }
 0x7cd   : > { %4550 = vmatmul.mubr.msk.bf16.vlgmr.msra.gmra.mrb[28].mxu0 %vm737_vm3, %v1445_v31 }
 0x7ce   : > { %4561 = vmatprep.mubr.msk.bf16.mxu0 %vm4828_vm1, %v4827_v3 }
 0x894   : > { %v1340_v32 = vpop.f32.mrb[20].mxu1 }
 0x895   : > { %v4533_v33 = vpop.f32.mrb[21].mxu1 }
 0x896   : > { %v1343_v34 = vpop.f32.mrb[22].mxu1 }
 0x897   : > { %v4534_v35 = vpop.f32.mrb[23].mxu1 }
 0x898   : > { %v1388_v36 = vpop.f32.mrb[24].mxu0 }
 0x899   : > { %v4619_v37 = vpack.i.bf16 %v1388_v36, %v1340_v32  ;;  %v4539_v38 = vpop.f32.mrb[25].mxu0 }
 0x89a   : > { %v1391_v39 = vpop.f32.mrb[26].mxu0  ;;  %v4062_v38 = vld [vmem:[%s5512_s15] ss:$0 sm:$0xff] }
 0x89b   : > { %v4540_v40 = vpop.f32.mrb[27].mxu0 }
 0x89c   : > { %v1438_v41 = vpop.f32.mrb[24].mxu1 }
 0x89d   : > { %v4545_v42 = vpop.f32.mrb[25].mxu1  ;;  %v1494_v43 = vsel %vm737_vm3, %v1438_v41, -inf }
 0x89e   : > { %1495 = vmax.xlane.f32.xlu0 %v1494_v43  ;;  %v1441_v45 = vpop.f32.mrb[26].mxu1  ;;  %v4801_v43 = vld [vmem:[#allocation2] sm:$0xff] }
 0x89f   : > { %v4546_v46 = vpop.f32.mrb[27].mxu1 }
 0x8a0   : > { %v1488_v47 = vpop.f32.mrb[28].mxu0 }
 0x8a1   : > { %v4551_v50 = vpop.f32.mrb[29].mxu0  ;;  %v1497_v51 = vsel %vm737_vm3, %v1488_v47, -inf }
 0x8a2   : > { %1498 = vmax.xlane.f32.xlu1 %v1497_v51  ;;  %v1491_v52 = vpop.f32.mrb[30].mxu0 }
 0x8a3   : > { %v4552_v53 = vpop.f32.mrb[31].mxu0 }
 0x8b3   : > { %1518 = vrot.lane.b32.xlu1 %v5010_v13, %s4839_s25 }
 0x8b7   : > { %4615 = vrot.lane.b32.xlu1 %v4614_v49, %s4840_s19 }
 0x8bb   : > { %4620 = vrot.lane.b32.xlu1 %v4619_v37, %s4841_s26 }
 0x92b   : > { %v1496_v54 = vpop.xlane.xlu0 %1495 }
 0x92c   : > { %v1500_v55 = vsub.f32 %v1438_v41, %v1496_v54 }
 0x92e   : > { %v1502_v56 = vmul.f32 1.442695, %v1500_v55 }
 0x92f   : > { %v1499_v57 = vpop.xlane.xlu1 %1498 }
 0x930   : > { %4785 = vpow2.f32 %v1502_v56  ;;  %v1501_v58 = vsub.f32 %v1488_v47, %v1499_v57  ;;  %v4802_v47 = vld [vmem:[#allocation2 + $0x8] sm:$0xff] }
 0x932   : > { %v1504_v60 = vmul.f32 1.442695, %v1501_v58 }
 0x933   : > { %v1519_v61 = vpop.permute.xlu1 %1518 }
 0x934   : > { %4787 = vpow2.f32 %v1504_v60  ;;  %v1524_v62 = vsel %vm862_vm4, %v1519_v61, 0 }
 0x935   : > { %4554 = vmatpush3.bf16.msra.mxu1 %v1524_v62 }
 0x936   : > { %4565 = vmatprep.subr.bf16.mxu1 %v4827_v3 }
 0x937   : > { %v4616_v23 = vpop.permute.xlu1 %4615 }
 0x938   : > { %v4618_v25 = vunpack.i.h.bf16 %v4616_v23  ;;  %v4617_v26 = vunpack.i.l.bf16 %v4616_v23 }
 0x93a   : > { %v4786_v13 = vpop.eup %4785  ;;  %v1639_v29 = vsel %vm737_vm3, %v5060_v63, %v4618_v25  ;;  %v1638_v30 = vsel %vm737_vm3, %v5058_v59, %v4617_v26 }
 0x93b   : > { %v1506_v44 = vsel %vm737_vm3, %v4786_v13, 0.0  ;;  %v4621_v24 = vpop.permute.xlu1 %4620 }
 0x93c   : > { %1507 = vadd.xlane.f32.xlu0 %v1506_v44  ;;  %v4623_v27 = vunpack.i.h.bf16 %v4621_v24  ;;  %v1772_v44 = vld [vmem:[%s4955_s0 + $0x40] sm:$0xff] }
 0x93e   : > { %v4788_v48 = vpop.eup %4787  ;;  %v1642_v34 = vsel %vm1640_vm5, %v1639_v29, %v4623_v27 }
 0x93f   : > { %v1509_v49 = vsel %vm737_vm3, %v4788_v48, 0.0 }
 0x940   : > { %1510 = vadd.xlane.f32.xlu0 %v1509_v49 }
 0x956   : > { %1566 = vrot.lane.b32.xlu0 %v5013_v16, %s4839_s25  ;;  %s5513_s25 = sld [smem:[#allocation11_spill]] }
 0x95c   : > { %s5514_s19 = smov %s5513_s25 }
 0x9c9   : > { %v1508_v0 = vpop.xlane.xlu0 %1507 }
 0x9ca   : > { %4789 = vrcp.f32 %v1508_v0  ;;  %v1773_v0 = vld [vmem:[%s4955_s0 + $0x48] sm:$0xff] }
 0x9cd   : > { %v1511_v1 = vpop.xlane.xlu0 %1510 }
 0x9ce   : > { %4791 = vrcp.f32 %v1511_v1 }
 0x9d1   : > { %v1567_v2 = vpop.permute.xlu0 %1566 }
 0x9d2   : > { %v1572_v4 = vsel %vm862_vm4, %v1567_v2, 0 }
 0x9d3   : > { %4560 = vmatpush3.bf16.msra.mxu0 %v1572_v4 }
 0x9d4   : > { %v4790_v5 = vpop.eup %4789 }
 0x9d5   : > { %v1514_v6 = vmul.f32 %v4790_v5, %v4786_v13  ;;  %v1770_v13 = vld [vmem:[%s4955_s0] sm:$0xff] }
 0x9d6   : > { %v4070_v49 = vcombine.high %v1770_v13, %v1772_v44  ;;  %v4069_v1 = vcombine.low %v1770_v13, %v1772_v44  ;;  %v1774_v5 = vld [vmem:[%s4955_s0 + $0x80] sm:$0xff]  ;;  %v4663_v13 = vld [vmem:[%s4970_s23 + $0x38] sm:$0xff]  }
 0x9d7   : > { %v1516_v7 = vpack.c.bf16 %v1514_v6, %v1514_v6  ;;  %v1776_v6 = vld [vmem:[%s4955_s0 + $0xc0] sm:$0xff]  ;;  %v4664_v44 = vld [vmem:[%s4970_s23 + $0xb8] sm:$0xff]  }
 0x9d8   : > { %v4792_v8 = vpop.eup %4791  ;;  %1843 = vmatprep.subr.bf16.mxu0 %v4070_v49  ;;  %v2279_v49 = vld [vmem:[%s4955_s0 + $0x50] sm:$0xff] }
 0x9d9   : > { %v1515_v9 = vmul.f32 %v4792_v8, %v4788_v48  ;;  %4556 = vmatmul.mubr.msk.bf16.vlgmr.msra.gmra.mrb[28].mxu1 %vm737_vm3, %v1516_v7  ;;  %v1771_v48 = vld [vmem:[%s4955_s0 + $0x8] sm:$0xff]  ;;  %v4074_v8 = vcombine.high %v1774_v5, %v1776_v6 }
 0x9da   : > { %4569 = vmatprep.mubr.msk.bf16.mxu1 %vm4828_vm1, %v4827_v3  ;;  %4566 = vmatpush3.bf16.msra.mxu1 %v4631_v10  ;;  %v4071_v2 = vcombine.low %v1771_v48, %v1773_v0  ;;  %v4072_v4 = vcombine.high %v1771_v48, %v1773_v0  ;;  %v1775_v7 = vld [vmem:[%s4955_s0 + $0x88] sm:$0xff]  ;;  %v2277_v48 = vld [vmem:[%s4955_s0 + $0x10] sm:$0xff]  ;;  %v2278_v0 = vld [vmem:[%s4955_s0 + $0x18] sm:$0xff] }
 0x9db   : > { %v1517_v16 = vpack.c.bf16 %v1515_v9, %v1515_v9  ;;  %4567 = vmatprep.subr.bf16.mxu1 %v4827_v3  ;;  %v4622_v3 = vunpack.i.l.bf16 %v4621_v24  ;;  %v1777_v9 = vld [vmem:[%s4955_s0 + $0xc8] sm:$0xff]  ;;  %v4066_v24 = vld [vmem:[%s635_s13] ss:$0 sm:$0xff] }
 0x9dc   : > { %v4075_v10 = vcombine.low %v1775_v7, %v1777_v9 }
 0x9dd   : > { %4562 = vmatmul.mubr.msk.bf16.vlgmr.msra.gmra.mrb[32].mxu0 %vm737_vm3, %v1517_v16  ;;  %v1641_v33 = vsel %vm1640_vm5, %v1638_v30, %v4622_v3  ;;  %v4073_v16 = vcombine.low %v1774_v5, %v1776_v6 }
 0x9de   : > { %4568 = vmatpush3.bf16.msra.mxu1 %v4632_v11  ;;  %1844 = vmatpush1.bf16.msra.mxu0 %v4069_v1  ;;  %v4076_v11 = vcombine.high %v1775_v7, %v1777_v9  ;;  %v4112_v1 = vcombine.high %v2277_v48, %v2279_v49  ;;  %v1780_v7 = vlaneseq }
 0x9df   : > { %1886 = vmatprep.subr.bf16.mxu1 %v4072_v4  ;;  %1845 = vmatprep.subr.bf16.mxu0 %v4074_v8  ;;  %v4111_v4 = vcombine.low %v2277_v48, %v2279_v49  ;;  %v4674_v48 = vld [vmem:[%s4970_s23 + $0x1d0] sm:$0xff]  }
 0x9e0   : > { %v1781_v8 = vshrl.u32 %v1780_v7, 7  ;;  %v4675_v49 = vld [vmem:[%s4970_s23 + $0x110] sm:$0xff]   ;;  %v4682_v7 = vld [vmem:[%s4970_s23 + $0x1e0] sm:$0xff]  }
 0x9e2   : > { %1846 = vmatpush1.bf16.msra.mxu0 %v4073_v16  ;;  %v5229_v9 = vsub.s32 0, %v1781_v8  ;;  %v5231_v16 = vsub.s32 2, %v1781_v8 }
 0xaac   : > { %v1560_v12 = vpop.f32.mrb[28].mxu1 }
 0xaad   : > { %v4557_v14 = vpop.f32.mrb[29].mxu1 }
 0xaae   : > { %v1563_v15 = vpop.f32.mrb[30].mxu1  ;;  %v4633_v14 = vld [vmem:[%s4970_s23 + $0x40] sm:$0xff]  }
 0xaaf   : > { %v4558_v17 = vpop.f32.mrb[31].mxu1  ;;  %v4634_v15 = vld [vmem:[%s4970_s23 + $0xc0] sm:$0xff]   ;;  %4285 = vmatprep.subr.bf16.mxu0 %v4633_v14  ;;  %v5236_v14 = vsub.s32 3, %v1781_v8 }
 0xab0   : > { %v1608_v18 = vpop.f32.mrb[32].mxu0 }
 0xab1   : > { %v4624_v19 = vpack.i.bf16 %v1608_v18, %v1560_v12  ;;  %v4563_v20 = vpop.f32.mrb[33].mxu0  ;;  %v4843_v12 = vmov 0  }
 0xab2   : > { %v1611_v21 = vpop.f32.mrb[34].mxu0  ;;  %1875 = vmatprep.mubr.bf16.mxu0 %v4843_v12 }
 0xab3   : > { %4625 = vrot.lane.b32.xlu0 %v4624_v19, %s4842_s27  ;;  %v4564_v22 = vpop.f32.mrb[35].mxu0 }
 0xb25   : > { %v4626_v28 = vpop.permute.xlu0 %4625 }
 0xb26   : > { %v4628_v31 = vunpack.i.h.bf16 %v4626_v28  ;;  %v4627_v32 = vunpack.i.l.bf16 %v4626_v28  ;;  %v4067_v28 = vld [vmem:[%s638_s14] ss:$0 sm:$0xff] }
 0xb28   : > { %v1645_v35 = vsel %vm1643_vm6, %v1642_v34, %v4628_v31  ;;  %v1644_v36 = vsel %vm1643_vm6, %v1641_v33, %v4627_v32  ;;  %v4635_v32 = vld [vmem:[%s4970_s23] sm:$0xff]  }
 0xb29   : > { %v1646_v37 = vpack.c.bf16 %v1645_v35, %v1644_v36  ;;  %v4636_v33 = vld [vmem:[%s4970_s23 + $0x80] sm:$0xff]   ;;  %v4637_v35 = vld [vmem:[%s4970_s23 + $0x48] sm:$0xff]  }
 0xb2a   : > { %v4638_v36 = vld [vmem:[%s4970_s23 + $0xc8] sm:$0xff]  }
 0xb2b   : > { %4570 = vmatmul.mubr.msk.bf16.vlgmr.msra.gmra.mrb[32].mxu1 %vm687_vm2, %v1646_v37  ;;  %v4639_v37 = vld [vmem:[%s4970_s23 + $0x8] sm:$0xff]  }
 0xb2c   : > { %1887 = vmatpush1.bf16.msra.mxu1 %v4071_v2  ;;  %1918 = vmatprep.mubr.bf16.mxu1 %v4843_v12  ;;  %v2280_v2 = vld [vmem:[%s4955_s0 + $0x58] sm:$0xff] }
 0xb2d   : > { %1888 = vmatprep.subr.bf16.mxu1 %v4076_v11  ;;  %v4113_v5 = vcombine.low %v2278_v0, %v2280_v2  ;;  %v4114_v6 = vcombine.high %v2278_v0, %v2280_v2  ;;  %v5234_v11 = vsub.s32 1, %v1781_v8  ;;  %v4676_v0 = vld [vmem:[%s4970_s23 + $0x190] sm:$0xff]   ;;  %v4678_v2 = vld [vmem:[%s4970_s23 + $0x1d8] sm:$0xff]   ;;  %v4683_v8 = vld [vmem:[%s4970_s23 + $0x120] sm:$0xff]  }
 0xb30   : > { %1889 = vmatpush1.bf16.msra.mxu1 %v4075_v10  ;;  %v1778_v10 = vld [vmem:[%s4960_s17] sm:$0xf] }
 0xb31   : > { %4307 = vmatprep.subr.bf16.mxu1 %v4634_v15  ;;  %v1783_v15 = vrot.slane %v1778_v10, %v5229_v9 }
 0xbfe   : > { %v1707_v39 = vpop.f32.mrb[32].mxu1 }
 0xbff   : > { %v1708_v40 = vadd.f32 %v4062_v38, %v1707_v39  ;;  %v4571_v63 = vpop.f32.mrb[33].mxu1  ;;  %v4641_v39 = vld [vmem:[%s4970_s23 + $0x50] sm:$0xff]  }
 0xc00   : > { %v1710_v41 = vpop.f32.mrb[34].mxu1  ;;  %v4643_v63 = vld [vmem:[%s4970_s23 + $0x10] sm:$0xff]  }
 0xc01   : > { %v1711_v42 = vadd.f32 %v4062_v38, %v1710_v41  ;;  %v4572_v59 = vpop.f32.mrb[35].mxu1  ;;  %v1714_v45 = vadd.f32 %v4801_v43, %v1708_v40  ;;  %v4640_v38 = vld [vmem:[%s4970_s23 + $0x88] sm:$0xff]   ;;  %v4642_v40 = vld [vmem:[%s4970_s23 + $0xd0] sm:$0xff]   ;;  %v4647_v43 = vld [vmem:[%s4970_s23 + $0x18] sm:$0xff]  }
 0xc02   : > { %v4644_v41 = vld [vmem:[%s4970_s23 + $0x90] sm:$0xff]   ;;  %v4646_v59 = vld [vmem:[%s4970_s23 + $0xd8] sm:$0xff]  }
 0xc03   : > { %v1718_v46 = vsel %vm687_vm2, %v1714_v45, 0.0  ;;  %v1715_v50 = vadd.f32 %v4802_v47, %v1711_v42  ;;  %v4645_v42 = vld [vmem:[%s4970_s23 + $0x58] sm:$0xff]   ;;  %v4650_v47 = vld [vmem:[%s4970_s23 + $0xe0] sm:$0xff]  }
 0xc04   : > { %1719 = vadd.xlane.f32.xlu1 %v1718_v46  ;;  %v4649_v46 = vld [vmem:[%s4970_s23 + $0x60] sm:$0xff]  }
 0xc05   : > { %v1721_v51 = vsel %vm687_vm2, %v1715_v50, 0.0 }
 0xc06   : > { %1722 = vadd.xlane.f32.xlu0 %v1721_v51  ;;  %v4652_v51 = vld [vmem:[%s4970_s23 + $0xa0] sm:$0xff]  }
 0xc91   : > { %v1720_v52 = vpop.xlane.xlu1 %1719 }
 0xc92   : > { %v1725_v53 = vmul.f32 0.03125, %v1720_v52  ;;  %v4653_v52 = vld [vmem:[%s4970_s23 + $0x68] sm:$0xff]  }
 0xc93   : > { %v1723_v54 = vpop.xlane.xlu0 %1722 }
 0xc94   : > { %v1727_v55 = vsub.f32 %v1714_v45, %v1725_v53  ;;  %v1726_v56 = vmul.f32 0.03125, %v1723_v54  ;;  %v4648_v45 = vld [vmem:[%s4970_s23 + $0x98] sm:$0xff]   ;;  %v4654_v53 = vld [vmem:[%s4970_s23 + $0xe8] sm:$0xff]  }
 0xc95   : > { %v4655_v54 = vld [vmem:[%s4970_s23 + $0x28] sm:$0xff]  }
 0xc96   : > { %v1728_v57 = vsub.f32 %v1715_v50, %v1726_v56  ;;  %v1729_v58 = vmul.f32 %v1727_v55, %v1727_v55  ;;  %v4651_v50 = vld [vmem:[%s4970_s23 + $0x20] sm:$0xff]   ;;  %v4657_v56 = vld [vmem:[%s4970_s23 + $0x70] sm:$0xff]  }
 0xc98   : > { %v1731_v60 = vsel %vm687_vm2, %v1729_v58, 0.0  ;;  %v1730_v61 = vmul.f32 %v1728_v57, %v1728_v57  ;;  %v4659_v58 = vld [vmem:[%s4970_s23 + $0x30] sm:$0xff]  }
 0xc99   : > { %1732 = vadd.xlane.f32.xlu0 %v1731_v60  ;;  %v4660_v60 = vld [vmem:[%s4970_s23 + $0xb0] sm:$0xff]  }
 0xc9a   : > { %v1734_v62 = vsel %vm687_vm2, %v1730_v61, 0.0  ;;  %v4661_v61 = vld [vmem:[%s4970_s23 + $0x78] sm:$0xff]  }
 0xc9b   : > { %1735 = vadd.xlane.f32.xlu1 %v1734_v62  ;;  %v4662_v62 = vld [vmem:[%s4970_s23 + $0xf8] sm:$0xff]  }
 0xd26   : > { %v1733_v17 = vpop.xlane.xlu0 %1732 }
 0xd27   : > { %v1737_v18 = vmul.f32 0.03125, %v1733_v17  ;;  %v1791_v17 = vrot.slane %v1778_v10, %v5231_v16 }
 0xd28   : > { %v1736_v19 = vpop.xlane.xlu1 %1735 }
 0xd29   : > { %v1739_v20 = vadd.f32 1e-05, %v1737_v18  ;;  %v1738_v21 = vmul.f32 0.03125, %v1736_v19 }
 0xd2b   : > { %4793 = vrsqrt.f32 %v1739_v20  ;;  %v1740_v22 = vadd.f32 1e-05, %v1738_v21  ;;  %v1787_v20 = vrot.slane %v1778_v10, %v5234_v11  ;;  %v1795_v21 = vrot.slane %v1778_v10, %v5236_v14  ;;  %v4684_v10 = vld [vmem:[%s4970_s23 + $0x1a0] sm:$0xff]  }
 0xd2d   : > { %4795 = vrsqrt.f32 %v1740_v22 }
 0xd35   : > { %v4794_v23 = vpop.eup %4793 }
 0xd36   : > { %v1743_v25 = vmul.f32 %v4794_v23, %v1727_v55  ;;  %v4656_v55 = vld [vmem:[%s4970_s23 + $0xa8] sm:$0xff]  }
 0xd37   : > { %v4796_v26 = vpop.eup %4795 }
 0xd38   : > { %v1751_v27 = vmul.f32 %v4066_v24, %v1743_v25  ;;  %v1744_v3 = vmul.f32 %v4796_v26, %v1728_v57  ;;  %v4658_v57 = vld [vmem:[%s4970_s23 + $0xf0] sm:$0xff]  }
 0xd3a   : > { %v1752_v29 = vmul.f32 %v4066_v24, %v1744_v3  ;;  %v5183_v30 = vadd.f32 %v4067_v28, %v1751_v27 }
 0xd3c   : > { %v5185_v31 = vadd.f32 %v4067_v28, %v1752_v29 }
 0xd3e   : > { %v5191_v34 = vpack.c.bf16 %v5185_v31, %v5183_v30 }
 0xd40   : > { %4077 = vmatmul.mubr.msk.bf16.vlgmr.msra.gmra.mrb[36].mxu0 %vm687_vm2, %v5191_v34  ;;  %4078 = vmatmul.mubr.msk.bf16.vlgmr.msra.gmra.mrb[36].mxu1 %vm687_vm2, %v5191_v34 }
 0xd41   : > { %4286 = vmatpush3.bf16.msra.mxu0 %v4635_v32  ;;  %4308 = vmatpush3.bf16.msra.mxu1 %v4636_v33 }
 0xd42   : > { %4287 = vmatprep.subr.bf16.mxu0 %v4637_v35  ;;  %4309 = vmatprep.subr.bf16.mxu1 %v4638_v36 }
 0xd45   : > { %4288 = vmatpush3.bf16.msra.mxu0 %v4639_v37  ;;  %4310 = vmatpush3.bf16.msra.mxu1 %v4640_v38 }
 0xd46   : > { %4289 = vmatprep.subr.bf16.mxu0 %v4641_v39  ;;  %4311 = vmatprep.subr.bf16.mxu1 %v4642_v40  ;;  %v2281_v40 = vld [vmem:[%s4955_s0 + $0x90] sm:$0xff] }
 0xd49   : > { %4290 = vmatpush3.bf16.msra.mxu0 %v4643_v63  ;;  %4312 = vmatpush3.bf16.msra.mxu1 %v4644_v41 }
 0xd4a   : > { %4291 = vmatprep.subr.bf16.mxu0 %v4645_v42  ;;  %4313 = vmatprep.subr.bf16.mxu1 %v4646_v59  ;;  %v2283_v42 = vld [vmem:[%s4955_s0 + $0xd0] sm:$0xff]  ;;  %v2282_v59 = vld [vmem:[%s4955_s0 + $0x98] sm:$0xff] }
 0xd4d   : > { %4292 = vmatpush3.bf16.msra.mxu0 %v4647_v43  ;;  %4314 = vmatpush3.bf16.msra.mxu1 %v4648_v45  ;;  %v2284_v43 = vld [vmem:[%s4955_s0 + $0xd8] sm:$0xff] }
 0xd4e   : > { %4293 = vmatprep.subr.bf16.mxu0 %v4649_v46  ;;  %4315 = vmatprep.subr.bf16.mxu1 %v4650_v47 }
 0xd51   : > { %4294 = vmatpush3.bf16.msra.mxu0 %v4651_v50  ;;  %4316 = vmatpush3.bf16.msra.mxu1 %v4652_v51  ;;  %v4116_v51 = vcombine.high %v2281_v40, %v2283_v42 }
 0xd52   : > { %4295 = vmatprep.subr.bf16.mxu0 %v4653_v52  ;;  %4317 = vmatprep.subr.bf16.mxu1 %v4654_v53  ;;  %v4118_v52 = vcombine.high %v2282_v59, %v2284_v43  ;;  %v4115_v53 = vcombine.low %v2281_v40, %v2283_v42 }
 0xd55   : > { %4296 = vmatpush3.bf16.msra.mxu0 %v4655_v54  ;;  %4318 = vmatpush3.bf16.msra.mxu1 %v4656_v55  ;;  %v4117_v54 = vcombine.low %v2282_v59, %v2284_v43  ;;  %v4665_v55 = vld [vmem:[%s4970_s23 + $0x140] sm:$0xff]  }
 0xd56   : > { %4297 = vmatprep.subr.bf16.mxu0 %v4657_v56  ;;  %4319 = vmatprep.subr.bf16.mxu1 %v4658_v57  ;;  %v4666_v56 = vld [vmem:[%s4970_s23 + $0x1c0] sm:$0xff]  }
 0xd57   : > { %v4667_v57 = vld [vmem:[%s4970_s23 + $0x100] sm:$0xff]  }
 0xd59   : > { %4298 = vmatpush3.bf16.msra.mxu0 %v4659_v58  ;;  %4320 = vmatpush3.bf16.msra.mxu1 %v4660_v60  ;;  %v4668_v58 = vld [vmem:[%s4970_s23 + $0x180] sm:$0xff]   ;;  %v4669_v60 = vld [vmem:[%s4970_s23 + $0x148] sm:$0xff]  }
 0xd5a   : > { %4299 = vmatprep.subr.bf16.mxu0 %v4661_v61  ;;  %4321 = vmatprep.subr.bf16.mxu1 %v4662_v62  ;;  %v4670_v61 = vld [vmem:[%s4970_s23 + $0x1c8] sm:$0xff]  }
 0xd5b   : > { %v4671_v62 = vld [vmem:[%s4970_s23 + $0x108] sm:$0xff]  }
 0xd5d   : > { %4300 = vmatpush3.bf16.msra.mxu0 %v4663_v13  ;;  %4322 = vmatpush3.bf16.msra.mxu1 %v4664_v44  ;;  %v4672_v13 = vld [vmem:[%s4970_s23 + $0x188] sm:$0xff]   ;;  %v4673_v44 = vld [vmem:[%s4970_s23 + $0x150] sm:$0xff]  }
 0xd5e   : > { %2347 = vmatprep.subr.bf16.mxu0 %v4112_v1  ;;  %2390 = vmatprep.subr.bf16.mxu1 %v4114_v6  ;;  %v4677_v1 = vld [vmem:[%s4970_s23 + $0x158] sm:$0xff]   ;;  %v4681_v6 = vld [vmem:[%s4970_s23 + $0x160] sm:$0xff]  }
 0xe13   : > { %v1877_v18 = vpop.f32.mrb[36].mxu0  ;;  %v1920_v19 = vpop.f32.mrb[36].mxu1 }
 0xe14   : > { %v1879_v22 = vpop.f32.mrb[37].mxu0  ;;  %v1922_v23 = vpop.f32.mrb[37].mxu1  ;;  %v1878_v26 = vadd.f32 %v1877_v18, %v1783_v15  ;;  %v1921_v27 = vadd.f32 %v1920_v19, %v1791_v17  ;;  %v4687_v18 = vld [vmem:[%s4970_s23 + $0x128] sm:$0xff]  }
 0xe15   : > { %v1881_v24 = vpop.f32.mrb[38].mxu0  ;;  %v1924_v25 = vpop.f32.mrb[38].mxu1  ;;  %v1880_v33 = vadd.f32 %v1879_v22, %v1787_v20  ;;  %v1923_v35 = vadd.f32 %v1922_v23, %v1795_v21  ;;  %v4688_v19 = vld [vmem:[%s4970_s23 + $0x1a8] sm:$0xff]   ;;  %v4691_v22 = vld [vmem:[%s4970_s23 + $0x130] sm:$0xff]  }
 0xe16   : > { %v1882_v3 = vadd.f32 %v1881_v24, %v1783_v15  ;;  %v1925_v28 = vadd.f32 %v1924_v25, %v1791_v17  ;;  %v1883_v29 = vpop.f32.mrb[39].mxu0  ;;  %v1926_v32 = vpop.f32.mrb[39].mxu1  ;;  %v4685_v15 = vld [vmem:[%s4970_s23 + $0x168] sm:$0xff]   ;;  %v4692_v23 = vld [vmem:[%s4970_s23 + $0x1b0] sm:$0xff]   ;;  %v4693_v24 = vld [vmem:[%s4970_s23 + $0x178] sm:$0xff]  }
 0xe17   : > { %v1884_v36 = vadd.f32 %v1883_v29, %v1787_v20  ;;  %v1927_v37 = vadd.f32 %v1926_v32, %v1795_v21  ;;  %v4686_v17 = vld [vmem:[%s4970_s23 + $0x1e8] sm:$0xff]   ;;  %v4689_v20 = vld [vmem:[%s4970_s23 + $0x170] sm:$0xff]   ;;  %v4694_v25 = vld [vmem:[%s4970_s23 + $0x1f8] sm:$0xff]  }
 0xe18   : > { %v1929_v38 = vpack.c.bf16 %v1882_v3, %v1878_v26  ;;  %v1931_v39 = vpack.c.bf16 %v1925_v28, %v1921_v27  ;;  %v4690_v21 = vld [vmem:[%s4970_s23 + $0x1f0] sm:$0xff]   ;;  %v4695_v26 = vld [vmem:[%s4970_s23 + $0x138] sm:$0xff]   ;;  %v5289_v3 = vld [vmem:[%s4955_s0 + $0x20] sm:$0xff] }
 0xe19   : > { %v1930_v63 = vpack.c.bf16 %v1884_v36, %v1880_v33  ;;  %v1932_v41 = vpack.c.bf16 %v1927_v37, %v1923_v35  ;;  %v4696_v27 = vld [vmem:[%s4970_s23 + $0x1b8] sm:$0xff]   ;;  %v2783_v28 = vld [vmem:[%s4955_s0 + $0x60] sm:$0xff]  ;;  %v2782_v29 = vld [vmem:[%s4955_s0 + $0x28] sm:$0xff] }
 0xe1a   : > { %v1933_v47 = vmax.bf16 %v4843_v12, %v1929_v38  ;;  %v1935_v50 = vmax.bf16 %v4843_v12, %v1931_v39  ;;  %v4154_v32 = vcombine.high %v5289_v3, %v2783_v28  ;;  %v2784_v33 = vld [vmem:[%s4955_s0 + $0x68] sm:$0xff]  ;;  %v4153_v35 = vcombine.low %v5289_v3, %v2783_v28 }
 0xe1b   : > { %v1934_v45 = vmax.bf16 %v4843_v12, %v1930_v63  ;;  %v1936_v46 = vmax.bf16 %v4843_v12, %v1932_v41  ;;  %v4155_v36 = vcombine.low %v2782_v29, %v2784_v33  ;;  %v4156_v37 = vcombine.high %v2782_v29, %v2784_v33  ;;  %v4698_v33 = vld [vmem:[%s4970_s23 + $0x2c0] sm:$0xff]  }
 0xe1d   : > { %2225 = vmatprep.mubr.bf16.mxu0 %v1934_v45  ;;  %2266 = vmatprep.mubr.bf16.mxu1 %v1936_v46 }
 0xe1e   : > { %2226 = vmatmul.mubr.bf16.vlgmr.msra.gmra.mrb[40].mxu0 %v1933_v47  ;;  %2267 = vmatmul.mubr.bf16.vlgmr.msra.gmra.mrb[40].mxu1 %v1935_v50 }
 0xe1f   : > { %2348 = vmatpush1.bf16.msra.mxu0 %v4111_v4  ;;  %2391 = vmatpush1.bf16.msra.mxu1 %v4113_v5  ;;  %v4679_v4 = vld [vmem:[%s4970_s23 + $0x118] sm:$0xff]  }
 0xe20   : > { %2349 = vmatprep.subr.bf16.mxu0 %v4116_v51  ;;  %2392 = vmatprep.subr.bf16.mxu1 %v4118_v52  ;;  %v4680_v5 = vld [vmem:[%s4970_s23 + $0x198] sm:$0xff]   ;;  %v2285_v52 = vld [vmem:[%s4960_s17 + $0x4] sm:$0xf] }
 0xe21   : > { %2379 = vmatprep.mubr.bf16.mxu0 %v4843_v12  ;;  %2422 = vmatprep.mubr.bf16.mxu1 %v4843_v12 }
 0xe23   : > { %2350 = vmatpush1.bf16.msra.mxu0 %v4115_v53  ;;  %2393 = vmatpush1.bf16.msra.mxu1 %v4117_v54  ;;  %v2290_v54 = vrot.slane %v2285_v52, %v5229_v9 }
 0xe24   : > { %4329 = vmatprep.subr.bf16.mxu0 %v4665_v55  ;;  %4351 = vmatprep.subr.bf16.mxu1 %v4666_v56  ;;  %v2298_v55 = vrot.slane %v2285_v52, %v5231_v16 }
 0xe26   : > { %4119 = vmatmul.mubr.msk.bf16.vlgmr.msra.gmra.mrb[44].mxu0 %vm687_vm2, %v5191_v34  ;;  %4120 = vmatmul.mubr.msk.bf16.vlgmr.msra.gmra.mrb[44].mxu1 %vm687_vm2, %v5191_v34 }
 0xe27   : > { %4330 = vmatpush3.bf16.msra.mxu0 %v4667_v57  ;;  %4352 = vmatpush3.bf16.msra.mxu1 %v4668_v58  ;;  %v2294_v58 = vrot.slane %v2285_v52, %v5234_v11 }
 0xe28   : > { %4331 = vmatprep.subr.bf16.mxu0 %v4669_v60  ;;  %4353 = vmatprep.subr.bf16.mxu1 %v4670_v61  ;;  %v2302_v60 = vrot.slane %v2285_v52, %v5236_v14  ;;  %v4714_v52 = vld [vmem:[%s4970_s23 + $0x2e0] sm:$0xff]  }
 0xe2b   : > { %4332 = vmatpush3.bf16.msra.mxu0 %v4671_v62  ;;  %4354 = vmatpush3.bf16.msra.mxu1 %v4672_v13 }
 0xe2c   : > { %4333 = vmatprep.subr.bf16.mxu0 %v4673_v44  ;;  %4355 = vmatprep.subr.bf16.mxu1 %v4674_v48 }
 0xe2f   : > { %4334 = vmatpush3.bf16.msra.mxu0 %v4675_v49  ;;  %4356 = vmatpush3.bf16.msra.mxu1 %v4676_v0 }
 0xe30   : > { %4335 = vmatprep.subr.bf16.mxu0 %v4677_v1  ;;  %4357 = vmatprep.subr.bf16.mxu1 %v4678_v2 }
 0xe33   : > { %4336 = vmatpush3.bf16.msra.mxu0 %v4679_v4  ;;  %4358 = vmatpush3.bf16.msra.mxu1 %v4680_v5 }
 0xe34   : > { %4337 = vmatprep.subr.bf16.mxu0 %v4681_v6  ;;  %4359 = vmatprep.subr.bf16.mxu1 %v4682_v7 }
 0xe37   : > { %4338 = vmatpush3.bf16.msra.mxu0 %v4683_v8  ;;  %4360 = vmatpush3.bf16.msra.mxu1 %v4684_v10 }
 0xe38   : > { %4339 = vmatprep.subr.bf16.mxu0 %v4685_v15  ;;  %4361 = vmatprep.subr.bf16.mxu1 %v4686_v17  ;;  %v2785_v17 = vld [vmem:[%s4955_s0 + $0xa0] sm:$0xff] }
 0xe3b   : > { %4340 = vmatpush3.bf16.msra.mxu0 %v4687_v18  ;;  %4362 = vmatpush3.bf16.msra.mxu1 %v4688_v19 }
 0xe3c   : > { %4341 = vmatprep.subr.bf16.mxu0 %v4689_v20  ;;  %4363 = vmatprep.subr.bf16.mxu1 %v4690_v21  ;;  %v2787_v20 = vld [vmem:[%s4955_s0 + $0xe0] sm:$0xff]  ;;  %v2786_v21 = vld [vmem:[%s4955_s0 + $0xa8] sm:$0xff] }
 0xe3d   : > { %v4157_v28 = vcombine.low %v2785_v17, %v2787_v20 }
 0xe3f   : > { %4342 = vmatpush3.bf16.msra.mxu0 %v4691_v22  ;;  %4364 = vmatpush3.bf16.msra.mxu1 %v4692_v23  ;;  %v2788_v22 = vld [vmem:[%s4955_s0 + $0xe8] sm:$0xff] }
 0xe40   : > { %4343 = vmatprep.subr.bf16.mxu0 %v4693_v24  ;;  %4365 = vmatprep.subr.bf16.mxu1 %v4694_v25  ;;  %v4160_v3 = vcombine.high %v2786_v21, %v2788_v22  ;;  %v4159_v29 = vcombine.low %v2786_v21, %v2788_v22 }
 0xe43   : > { %4344 = vmatpush3.bf16.msra.mxu0 %v4695_v26  ;;  %4366 = vmatpush3.bf16.msra.mxu1 %v4696_v27  ;;  %v4158_v27 = vcombine.high %v2785_v17, %v2787_v20 }
 0xe44   : > { %2851 = vmatprep.subr.bf16.mxu0 %v4154_v32  ;;  %2894 = vmatprep.subr.bf16.mxu1 %v4156_v37  ;;  %v4697_v32 = vld [vmem:[%s4970_s23 + $0x240] sm:$0xff]  }
 0xe45   : > { %v4700_v37 = vld [vmem:[%s4970_s23 + $0x280] sm:$0xff]  }
 0xef1   : > { %v4301_v38 = vpop.f32.mrb[40].mxu0  ;;  %v4323_v39 = vpop.f32.mrb[40].mxu1 }
 0xef2   : > { %v4302_v40 = vpop.f32.mrb[41].mxu0  ;;  %v4324_v63 = vpop.f32.mrb[41].mxu1 }
 0xef3   : > { %v4303_v41 = vadd.f32 %v4302_v40, %v4301_v38  ;;  %v4325_v42 = vadd.f32 %v4324_v63, %v4323_v39  ;;  %v4304_v59 = vpop.f32.mrb[42].mxu0  ;;  %v4326_v43 = vpop.f32.mrb[42].mxu1  ;;  %v4702_v38 = vld [vmem:[%s4970_s23 + $0x2c8] sm:$0xff]   ;;  %v4705_v63 = vld [vmem:[%s4970_s23 + $0x250] sm:$0xff]  }
 0xef4   : > { %v4305_v45 = vpop.f32.mrb[43].mxu0  ;;  %v4327_v46 = vpop.f32.mrb[43].mxu1  ;;  %v4703_v39 = vld [vmem:[%s4970_s23 + $0x208] sm:$0xff]  }
 0xef5   : > { %v5296_v47 = vadd.f32 %v4325_v42, %v4303_v41  ;;  %v4306_v50 = vadd.f32 %v4305_v45, %v4304_v59  ;;  %v4328_v51 = vadd.f32 %v4327_v46, %v4326_v43  ;;  %v4704_v40 = vld [vmem:[%s4970_s23 + $0x288] sm:$0xff]   ;;  %v4706_v41 = vld [vmem:[%s4970_s23 + $0x2d0] sm:$0xff]   ;;  %v4709_v43 = vld [vmem:[%s4970_s23 + $0x258] sm:$0xff]  }
 0xef6   : > { %v4707_v42 = vld [vmem:[%s4970_s23 + $0x210] sm:$0xff]   ;;  %v4710_v45 = vld [vmem:[%s4970_s23 + $0x2d8] sm:$0xff]  }
 0xef7   : > { %v5299_v53 = vadd.f32 %v4328_v51, %v4306_v50  ;;  %v4708_v59 = vld [vmem:[%s4970_s23 + $0x290] sm:$0xff]   ;;  %v4711_v46 = vld [vmem:[%s4970_s23 + $0x218] sm:$0xff]   ;;  %v4713_v51 = vld [vmem:[%s4970_s23 + $0x260] sm:$0xff]  }
 0xef8   : > { %v4712_v50 = vld [vmem:[%s4970_s23 + $0x298] sm:$0xff]  }
 0xef9   : > { %v2381_v56 = vpop.f32.mrb[44].mxu0  ;;  %v2424_v57 = vpop.f32.mrb[44].mxu1 }
 0xefa   : > { %v2383_v61 = vpop.f32.mrb[45].mxu0  ;;  %v2426_v62 = vpop.f32.mrb[45].mxu1  ;;  %v2382_v48 = vadd.f32 %v2381_v56, %v2290_v54  ;;  %v2425_v49 = vadd.f32 %v2424_v57, %v2298_v55  ;;  %v4717_v56 = vld [vmem:[%s4970_s23 + $0x268] sm:$0xff]  }
 0xefb   : > { %v2385_v13 = vpop.f32.mrb[46].mxu0  ;;  %v2428_v44 = vpop.f32.mrb[46].mxu1  ;;  %v2384_v5 = vadd.f32 %v2383_v61, %v2294_v58  ;;  %v2427_v6 = vadd.f32 %v2426_v62, %v2302_v60  ;;  %v4718_v57 = vld [vmem:[%s4970_s23 + $0x2e8] sm:$0xff]   ;;  %v4721_v61 = vld [vmem:[%s4970_s23 + $0x270] sm:$0xff]  }
 0xefc   : > { %v2386_v0 = vadd.f32 %v2385_v13, %v2290_v54  ;;  %v2429_v1 = vadd.f32 %v2428_v44, %v2298_v55  ;;  %v2387_v2 = vpop.f32.mrb[47].mxu0  ;;  %v2430_v4 = vpop.f32.mrb[47].mxu1  ;;  %v4715_v54 = vld [vmem:[%s4970_s23 + $0x220] sm:$0xff]   ;;  %v4722_v62 = vld [vmem:[%s4970_s23 + $0x2f0] sm:$0xff]  }
 0xefd   : > { %v2388_v7 = vadd.f32 %v2387_v2, %v2294_v58  ;;  %v2431_v8 = vadd.f32 %v2430_v4, %v2302_v60  ;;  %v4716_v55 = vld [vmem:[%s4970_s23 + $0x2a0] sm:$0xff]   ;;  %v4719_v58 = vld [vmem:[%s4970_s23 + $0x228] sm:$0xff]   ;;  %v4723_v13 = vld [vmem:[%s4970_s23 + $0x230] sm:$0xff]  }
 0xefe   : > { %v2433_v10 = vpack.c.bf16 %v2386_v0, %v2382_v48  ;;  %v2435_v15 = vpack.c.bf16 %v2429_v1, %v2425_v49  ;;  %v4720_v60 = vld [vmem:[%s4970_s23 + $0x2a8] sm:$0xff]   ;;  %v4724_v44 = vld [vmem:[%s4970_s23 + $0x2b0] sm:$0xff]   ;;  %v4725_v48 = vld [vmem:[%s4970_s23 + $0x278] sm:$0xff]  }
 0xeff   : > { %v2434_v18 = vpack.c.bf16 %v2388_v7, %v2384_v5  ;;  %v2436_v19 = vpack.c.bf16 %v2431_v8, %v2427_v6  ;;  %v4726_v49 = vld [vmem:[%s4970_s23 + $0x2f8] sm:$0xff]   ;;  %v5352_v2 = vld [vmem:[%s4955_s0 + $0x30] sm:$0xff] }
 0xf00   : > { %v2437_v25 = vmax.bf16 %v4843_v12, %v2433_v10  ;;  %v2439_v26 = vmax.bf16 %v4843_v12, %v2435_v15  ;;  %v4727_v0 = vld [vmem:[%s4970_s23 + $0x238] sm:$0xff]   ;;  %v5355_v4 = vld [vmem:[%s4955_s0 + $0x70] sm:$0xff] }
 0xf01   : > { %v2438_v23 = vmax.bf16 %v4843_v12, %v2434_v18  ;;  %v2440_v24 = vmax.bf16 %v4843_v12, %v2436_v19  ;;  %v4728_v1 = vld [vmem:[%s4970_s23 + $0x2b8] sm:$0xff]   ;;  %v4196_v6 = vcombine.high %v5352_v2, %v5355_v4  ;;  %v4195_v8 = vcombine.low %v5352_v2, %v5355_v4  ;;  %v4068_v19 = vld [vmem:[%s632_s21] ss:$0 sm:$0xff] }
 0xf02   : > { %v5358_v5 = vld [vmem:[%s4955_s0 + $0x38] sm:$0xff] }
 0xf03   : > { %2729 = vmatprep.mubr.bf16.mxu0 %v2438_v23  ;;  %2770 = vmatprep.mubr.bf16.mxu1 %v2440_v24  ;;  %v5363_v7 = vld [vmem:[%s4955_s0 + $0x78] sm:$0xff] }
 0xf04   : > { %2730 = vmatmul.mubr.bf16.vlgmr.msra.gmra.mrb[48].mxu0 %v2437_v25  ;;  %2771 = vmatmul.mubr.bf16.vlgmr.msra.gmra.mrb[48].mxu1 %v2439_v26  ;;  %v4197_v10 = vcombine.low %v5358_v5, %v5363_v7  ;;  %v4198_v15 = vcombine.high %v5358_v5, %v5363_v7 }
 0xf05   : > { %2852 = vmatpush1.bf16.msra.mxu0 %v4153_v35  ;;  %2895 = vmatpush1.bf16.msra.mxu1 %v4155_v36  ;;  %v4699_v35 = vld [vmem:[%s4970_s23 + $0x200] sm:$0xff]   ;;  %v4701_v36 = vld [vmem:[%s4970_s23 + $0x248] sm:$0xff]  }
 0xf06   : > { %2853 = vmatprep.subr.bf16.mxu0 %v4158_v27  ;;  %2896 = vmatprep.subr.bf16.mxu1 %v4160_v3  ;;  %v2275_v3 = vadd.f32 %v4068_v19, %v5296_v47 }
 0xf07   : > { %2883 = vmatprep.mubr.bf16.mxu0 %v4843_v12  ;;  %2926 = vmatprep.mubr.bf16.mxu1 %v4843_v12 }
 0xf09   : > { %2854 = vmatpush1.bf16.msra.mxu0 %v4157_v28  ;;  %2897 = vmatpush1.bf16.msra.mxu1 %v4159_v29 }
 0xf0a   : > { %4373 = vmatprep.subr.bf16.mxu0 %v4697_v32  ;;  %4395 = vmatprep.subr.bf16.mxu1 %v4698_v33  ;;  %v2789_v33 = vld [vmem:[%s4960_s17 + $0x8] sm:$0xf] }
 0xf0b   : > { %v2806_v47 = vrot.slane %v2789_v33, %v5236_v14 }
 0xf0c   : > { %4161 = vmatmul.mubr.msk.bf16.vlgmr.msra.gmra.mrb[52].mxu0 %vm687_vm2, %v5191_v34  ;;  %4162 = vmatmul.mubr.msk.bf16.vlgmr.msra.gmra.mrb[52].mxu1 %vm687_vm2, %v5191_v34 }
 0xf0d   : > { %4374 = vmatpush3.bf16.msra.mxu0 %v4699_v35  ;;  %4396 = vmatpush3.bf16.msra.mxu1 %v4700_v37  ;;  %v2276_v35 = vadd.f32 %v4068_v19, %v5299_v53  ;;  %v4729_v19 = vld [vmem:[%s4970_s23 + $0x340] sm:$0xff]  }
 0xf0e   : > { %4375 = vmatprep.subr.bf16.mxu0 %v4701_v36  ;;  %4397 = vmatprep.subr.bf16.mxu1 %v4702_v38  ;;  %v2794_v38 = vrot.slane %v2789_v33, %v5229_v9 }
 0xf11   : > { %4376 = vmatpush3.bf16.msra.mxu0 %v4703_v39  ;;  %4398 = vmatpush3.bf16.msra.mxu1 %v4704_v40  ;;  %v2802_v39 = vrot.slane %v2789_v33, %v5231_v16 }
 0xf12   : > { %4377 = vmatprep.subr.bf16.mxu0 %v4705_v63  ;;  %4399 = vmatprep.subr.bf16.mxu1 %v4706_v41 }
 0xf15   : > { %4378 = vmatpush3.bf16.msra.mxu0 %v4707_v42  ;;  %4400 = vmatpush3.bf16.msra.mxu1 %v4708_v59  ;;  %v2798_v42 = vrot.slane %v2789_v33, %v5234_v11  ;;  %v4745_v33 = vld [vmem:[%s4970_s23 + $0x360] sm:$0xff]  }
 0xf16   : > { %4379 = vmatprep.subr.bf16.mxu0 %v4709_v43  ;;  %4401 = vmatprep.subr.bf16.mxu1 %v4710_v45 }
 0xf19   : > { %4380 = vmatpush3.bf16.msra.mxu0 %v4711_v46  ;;  %4402 = vmatpush3.bf16.msra.mxu1 %v4712_v50 }
 0xf1a   : > { %4381 = vmatprep.subr.bf16.mxu0 %v4713_v51  ;;  %4403 = vmatprep.subr.bf16.mxu1 %v4714_v52 }
 0xf1d   : > { %4382 = vmatpush3.bf16.msra.mxu0 %v4715_v54  ;;  %4404 = vmatpush3.bf16.msra.mxu1 %v4716_v55 }
 0xf1e   : > { %4383 = vmatprep.subr.bf16.mxu0 %v4717_v56  ;;  %4405 = vmatprep.subr.bf16.mxu1 %v4718_v57 }
 0xf21   : > { %4384 = vmatpush3.bf16.msra.mxu0 %v4719_v58  ;;  %4406 = vmatpush3.bf16.msra.mxu1 %v4720_v60 }
 0xf22   : > { %4385 = vmatprep.subr.bf16.mxu0 %v4721_v61  ;;  %4407 = vmatprep.subr.bf16.mxu1 %v4722_v62 }
 0xf25   : > { %4386 = vmatpush3.bf16.msra.mxu0 %v4723_v13  ;;  %4408 = vmatpush3.bf16.msra.mxu1 %v4724_v44  ;;  %v3289_v13 = vld [vmem:[%s4955_s0 + $0xb0] sm:$0xff] }
 0xf26   : > { %4387 = vmatprep.subr.bf16.mxu0 %v4725_v48  ;;  %4409 = vmatprep.subr.bf16.mxu1 %v4726_v49  ;;  %v3291_v49 = vld [vmem:[%s4955_s0 + $0xf0] sm:$0xff] }
 0xf27   : > { %v4200_v7 = vcombine.high %v3289_v13, %v3291_v49 }
 0xf29   : > { %4388 = vmatpush3.bf16.msra.mxu0 %v4727_v0  ;;  %4410 = vmatpush3.bf16.msra.mxu1 %v4728_v1  ;;  %v3290_v0 = vld [vmem:[%s4955_s0 + $0xb8] sm:$0xff] }
 0xf2a   : > { %3355 = vmatprep.subr.bf16.mxu0 %v4196_v6  ;;  %3398 = vmatprep.subr.bf16.mxu1 %v4198_v15  ;;  %v3292_v1 = vld [vmem:[%s4955_s0 + $0xf8] sm:$0xff] }
 0xf2b   : > { %v4202_v15 = vcombine.high %v3290_v0, %v3292_v1 }
 0xfd7   : > { %v4345_v17 = vpop.f32.mrb[48].mxu0  ;;  %v4367_v18 = vpop.f32.mrb[48].mxu1 }
 0xfd8   : > { %v4346_v20 = vpop.f32.mrb[49].mxu0  ;;  %v4368_v21 = vpop.f32.mrb[49].mxu1 }
 0xfd9   : > { %v4347_v22 = vadd.f32 %v4346_v20, %v4345_v17  ;;  %v4369_v23 = vadd.f32 %v4368_v21, %v4367_v18  ;;  %v4348_v24 = vpop.f32.mrb[50].mxu0  ;;  %v4370_v25 = vpop.f32.mrb[50].mxu1  ;;  %v4199_v17 = vcombine.low %v3289_v13, %v3291_v49  ;;  %v4201_v18 = vcombine.low %v3290_v0, %v3292_v1  ;;  %v4730_v20 = vld [vmem:[%s4970_s23 + $0x3c0] sm:$0xff]   ;;  %v3293_v0 = vld [vmem:[%s4960_s17 + $0xc] sm:$0xf] }
 0xfda   : > { %v4349_v26 = vpop.f32.mrb[51].mxu0  ;;  %v4371_v27 = vpop.f32.mrb[51].mxu1  ;;  %v4732_v21 = vld [vmem:[%s4970_s23 + $0x380] sm:$0xff]  }
 0xfdb   : > { %v2773_v28 = vadd.f32 %v4369_v23, %v4347_v22  ;;  %v4350_v29 = vadd.f32 %v4349_v26, %v4348_v24  ;;  %v4372_v32 = vadd.f32 %v4371_v27, %v4370_v25  ;;  %v4734_v22 = vld [vmem:[%s4970_s23 + $0x3c8] sm:$0xff]   ;;  %v4737_v25 = vld [vmem:[%s4970_s23 + $0x350] sm:$0xff]  }
 0xfdc   : > { %v4735_v23 = vld [vmem:[%s4970_s23 + $0x308] sm:$0xff]   ;;  %v4738_v26 = vld [vmem:[%s4970_s23 + $0x3d0] sm:$0xff]  }
 0xfdd   : > { %v5379_v37 = vadd.f32 %v2773_v28, %v2275_v3  ;;  %v2776_v36 = vadd.f32 %v4372_v32, %v4350_v29  ;;  %v4736_v24 = vld [vmem:[%s4970_s23 + $0x388] sm:$0xff]   ;;  %v4739_v27 = vld [vmem:[%s4970_s23 + $0x310] sm:$0xff]   ;;  %v4742_v28 = vld [vmem:[%s4970_s23 + $0x3d8] sm:$0xff]  }
 0xfde   : > { %v4740_v3 = vld [vmem:[%s4970_s23 + $0x390] sm:$0xff]   ;;  %v4743_v29 = vld [vmem:[%s4970_s23 + $0x318] sm:$0xff]  }
 0xfdf   : > { %v5383_v40 = vadd.f32 %v2776_v36, %v2276_v35  ;;  %v2885_v63 = vpop.f32.mrb[52].mxu0  ;;  %v2928_v41 = vpop.f32.mrb[52].mxu1  ;;  %v4744_v32 = vld [vmem:[%s4970_s23 + $0x398] sm:$0xff]   ;;  %v4746_v35 = vld [vmem:[%s4970_s23 + $0x3e0] sm:$0xff]  }
 0xfe0   : > { %v2887_v59 = vpop.f32.mrb[53].mxu0  ;;  %v2930_v43 = vpop.f32.mrb[53].mxu1  ;;  %v2886_v46 = vadd.f32 %v2885_v63, %v2794_v38  ;;  %v2929_v50 = vadd.f32 %v2928_v41, %v2802_v39  ;;  %v4747_v36 = vld [vmem:[%s4970_s23 + $0x320] sm:$0xff]   ;;  %v4750_v63 = vld [vmem:[%s4970_s23 + $0x3e8] sm:$0xff]  }
 0xfe1   : > { %v2889_v45 = vpop.f32.mrb[54].mxu0  ;;  %v2932_v53 = vpop.f32.mrb[54].mxu1  ;;  %v2888_v56 = vadd.f32 %v2887_v59, %v2798_v42  ;;  %v2931_v57 = vadd.f32 %v2930_v43, %v2806_v47  ;;  %v4751_v41 = vld [vmem:[%s4970_s23 + $0x328] sm:$0xff]   ;;  %v4754_v59 = vld [vmem:[%s4970_s23 + $0x3f0] sm:$0xff]  }
 0xfe2   : > { %v2890_v51 = vadd.f32 %v2889_v45, %v2794_v38  ;;  %v2933_v52 = vadd.f32 %v2932_v53, %v2802_v39  ;;  %v2891_v54 = vpop.f32.mrb[55].mxu0  ;;  %v2934_v55 = vpop.f32.mrb[55].mxu1  ;;  %v4748_v38 = vld [vmem:[%s4970_s23 + $0x3a0] sm:$0xff]   ;;  %v4749_v39 = vld [vmem:[%s4970_s23 + $0x368] sm:$0xff]   ;;  %v4755_v43 = vld [vmem:[%s4970_s23 + $0x330] sm:$0xff]  }
 0xfe3   : > { %v2892_v58 = vadd.f32 %v2891_v54, %v2798_v42  ;;  %v2935_v60 = vadd.f32 %v2934_v55, %v2806_v47  ;;  %v4752_v42 = vld [vmem:[%s4970_s23 + $0x3a8] sm:$0xff]   ;;  %v4753_v47 = vld [vmem:[%s4970_s23 + $0x370] sm:$0xff]   ;;  %v4757_v53 = vld [vmem:[%s4970_s23 + $0x378] sm:$0xff]  }
 0xfe4   : > { %v2937_v61 = vpack.c.bf16 %v2890_v51, %v2886_v46  ;;  %v2939_v62 = vpack.c.bf16 %v2933_v52, %v2929_v50  ;;  %v4756_v45 = vld [vmem:[%s4970_s23 + $0x3b0] sm:$0xff]   ;;  %v4758_v46 = vld [vmem:[%s4970_s23 + $0x3f8] sm:$0xff]  }
 0xfe5   : > { %v2938_v44 = vpack.c.bf16 %v2892_v58, %v2888_v56  ;;  %v2940_v48 = vpack.c.bf16 %v2935_v60, %v2931_v57  ;;  %v4759_v50 = vld [vmem:[%s4970_s23 + $0x338] sm:$0xff]  }
 0xfe6   : > { %v2941_v5 = vmax.bf16 %v4843_v12, %v2937_v61  ;;  %v2943_v6 = vmax.bf16 %v4843_v12, %v2939_v62  ;;  %v4760_v51 = vld [vmem:[%s4970_s23 + $0x3b8] sm:$0xff]  }
 0xfe7   : > { %v2942_v2 = vmax.bf16 %v4843_v12, %v2938_v44  ;;  %v2944_v4 = vmax.bf16 %v4843_v12, %v2940_v48 }
 0xfe9   : > { %3233 = vmatprep.mubr.bf16.mxu0 %v2942_v2  ;;  %3274 = vmatprep.mubr.bf16.mxu1 %v2944_v4  ;;  %v3298_v4 = vrot.slane %v3293_v0, %v5229_v9 }
 0xfea   : > { %3234 = vmatmul.mubr.bf16.vlgmr.msra.gmra.mrb[56].mxu0 %v2941_v5  ;;  %3275 = vmatmul.mubr.bf16.vlgmr.msra.gmra.mrb[56].mxu1 %v2943_v6  ;;  %v3306_v5 = vrot.slane %v3293_v0, %v5231_v16 }
 0xfeb   : > { %3356 = vmatpush1.bf16.msra.mxu0 %v4195_v8  ;;  %3399 = vmatpush1.bf16.msra.mxu1 %v4197_v10  ;;  %v4731_v8 = vld [vmem:[%s4970_s23 + $0x300] sm:$0xff]   ;;  %v4733_v10 = vld [vmem:[%s4970_s23 + $0x348] sm:$0xff]  }
 0xfec   : > { %3357 = vmatprep.subr.bf16.mxu0 %v4200_v7  ;;  %3400 = vmatprep.subr.bf16.mxu1 %v4202_v15 }
 0xfed   : > { %3387 = vmatprep.mubr.bf16.mxu0 %v4843_v12  ;;  %3430 = vmatprep.mubr.bf16.mxu1 %v4843_v12 }
 0xfef   : > { %3358 = vmatpush1.bf16.msra.mxu0 %v4199_v17  ;;  %3401 = vmatpush1.bf16.msra.mxu1 %v4201_v18  ;;  %v3302_v17 = vrot.slane %v3293_v0, %v5234_v11  ;;  %v3310_v18 = vrot.slane %v3293_v0, %v5236_v14 }
 0xff0   : > { %4417 = vmatprep.subr.bf16.mxu0 %v4729_v19  ;;  %4439 = vmatprep.subr.bf16.mxu1 %v4730_v20 }
 0xff2   : > { %4203 = vmatmul.mubr.msk.bf16.vlgmr.msra.gmra.mrb[60].mxu0 %vm687_vm2, %v5191_v34  ;;  %4204 = vmatmul.mubr.msk.bf16.vlgmr.msra.gmra.mrb[60].mxu1 %vm687_vm2, %v5191_v34  ;;  %v4741_v34 = vld [vmem:[%s4970_s23 + $0x358] sm:$0xff]  }
 0xff3   : > { %4418 = vmatpush3.bf16.msra.mxu0 %v4731_v8  ;;  %4440 = vmatpush3.bf16.msra.mxu1 %v4732_v21 }
 0xff4   : > { %4419 = vmatprep.subr.bf16.mxu0 %v4733_v10  ;;  %4441 = vmatprep.subr.bf16.mxu1 %v4734_v22 }
 0xff7   : > { %4420 = vmatpush3.bf16.msra.mxu0 %v4735_v23  ;;  %4442 = vmatpush3.bf16.msra.mxu1 %v4736_v24 }
 0xff8   : > { %4421 = vmatprep.subr.bf16.mxu0 %v4737_v25  ;;  %4443 = vmatprep.subr.bf16.mxu1 %v4738_v26 }
 0xffb   : > { %4422 = vmatpush3.bf16.msra.mxu0 %v4739_v27  ;;  %4444 = vmatpush3.bf16.msra.mxu1 %v4740_v3 }
 0xffc   : > { %4423 = vmatprep.subr.bf16.mxu0 %v4741_v34  ;;  %4445 = vmatprep.subr.bf16.mxu1 %v4742_v28 }
 0xfff   : > { %4424 = vmatpush3.bf16.msra.mxu0 %v4743_v29  ;;  %4446 = vmatpush3.bf16.msra.mxu1 %v4744_v32 }
0x1000   : > { %4425 = vmatprep.subr.bf16.mxu0 %v4745_v33  ;;  %4447 = vmatprep.subr.bf16.mxu1 %v4746_v35 }
0x1003   : > { %4426 = vmatpush3.bf16.msra.mxu0 %v4747_v36  ;;  %4448 = vmatpush3.bf16.msra.mxu1 %v4748_v38 }
0x1004   : > { %4427 = vmatprep.subr.bf16.mxu0 %v4749_v39  ;;  %4449 = vmatprep.subr.bf16.mxu1 %v4750_v63 }
0x1007   : > { %4428 = vmatpush3.bf16.msra.mxu0 %v4751_v41  ;;  %4450 = vmatpush3.bf16.msra.mxu1 %v4752_v42 }
0x1008   : > { %4429 = vmatprep.subr.bf16.mxu0 %v4753_v47  ;;  %4451 = vmatprep.subr.bf16.mxu1 %v4754_v59 }
0x100b   : > { %4430 = vmatpush3.bf16.msra.mxu0 %v4755_v43  ;;  %4452 = vmatpush3.bf16.msra.mxu1 %v4756_v45 }
0x100c   : > { %4431 = vmatprep.subr.bf16.mxu0 %v4757_v53  ;;  %4453 = vmatprep.subr.bf16.mxu1 %v4758_v46 }
0x100f   : > { %4432 = vmatpush3.bf16.msra.mxu0 %v4759_v50  ;;  %4454 = vmatpush3.bf16.msra.mxu1 %v4760_v51 }
0x10bd   : > { %v4389_v52 = vpop.f32.mrb[56].mxu0  ;;  %v4411_v54 = vpop.f32.mrb[56].mxu1 }
0x10be   : > { %v4390_v55 = vpop.f32.mrb[57].mxu0  ;;  %v4412_v56 = vpop.f32.mrb[57].mxu1 }
0x10bf   : > { %v4391_v57 = vadd.f32 %v4390_v55, %v4389_v52  ;;  %v4413_v58 = vadd.f32 %v4412_v56, %v4411_v54  ;;  %v4392_v60 = vpop.f32.mrb[58].mxu0  ;;  %v4414_v61 = vpop.f32.mrb[58].mxu1 }
0x10c0   : > { %v4393_v62 = vpop.f32.mrb[59].mxu0  ;;  %v4415_v13 = vpop.f32.mrb[59].mxu1 }
0x10c1   : > { %v3277_v44 = vadd.f32 %v4413_v58, %v4391_v57  ;;  %v4394_v48 = vadd.f32 %v4393_v62, %v4392_v60  ;;  %v4416_v49 = vadd.f32 %v4415_v13, %v4414_v61 }
0x10c3   : > { %v3283_v1 = vadd.f32 %v3277_v44, %v5379_v37  ;;  %v3280_v2 = vadd.f32 %v4416_v49, %v4394_v48 }
0x10c5   : > { %v3284_v6 = vadd.f32 %v3280_v2, %v5383_v40  ;;  %v3389_v7 = vpop.f32.mrb[60].mxu0  ;;  %v3432_v15 = vpop.f32.mrb[60].mxu1 }
0x10c6   : > { %v3391_v19 = vpop.f32.mrb[61].mxu0  ;;  %v3434_v20 = vpop.f32.mrb[61].mxu1  ;;  %v3390_v10 = vadd.f32 %v3389_v7, %v3298_v4  ;;  %v3433_v22 = vadd.f32 %v3432_v15, %v3306_v5 }
0x10c7   : > { %v3393_v8 = vpop.f32.mrb[62].mxu0  ;;  %v3436_v21 = vpop.f32.mrb[62].mxu1  ;;  %v3392_v25 = vadd.f32 %v3391_v19, %v3302_v17  ;;  %v3435_v16 = vadd.f32 %v3434_v20, %v3310_v18 }
0x10c8   : > { %v3394_v37 = vadd.f32 %v3393_v8, %v3298_v4  ;;  %v3437_v23 = vadd.f32 %v3436_v21, %v3306_v5  ;;  %v3395_v24 = vpop.f32.mrb[63].mxu0  ;;  %v3438_v9 = vpop.f32.mrb[63].mxu1 }
0x10c9   : > { %v3396_v26 = vadd.f32 %v3395_v24, %v3302_v17  ;;  %v3439_v40 = vadd.f32 %v3438_v9, %v3310_v18  ;;  %v4238_v17 = vld [vmem:[%s644_s20] ss:$0 sm:$0xff] }
0x10ca   : > { %v3441_v27 = vpack.c.bf16 %v3394_v37, %v3390_v10  ;;  %v3443_v3 = vpack.c.bf16 %v3437_v23, %v3433_v22 }
0x10cb   : > { %v3442_v34 = vpack.c.bf16 %v3396_v26, %v3392_v25  ;;  %v3444_v11 = vpack.c.bf16 %v3439_v40, %v3435_v16 }
0x10cc   : > { %v3445_v29 = vmax.bf16 %v4843_v12, %v3441_v27  ;;  %v3447_v32 = vmax.bf16 %v4843_v12, %v3443_v3 }
0x10cd   : > { %v3446_v14 = vmax.bf16 %v4843_v12, %v3442_v34  ;;  %v3448_v28 = vmax.bf16 %v4843_v12, %v3444_v11 }
0x10cf   : > { %3737 = vmatprep.mubr.bf16.mxu0 %v3446_v14  ;;  %3778 = vmatprep.mubr.bf16.mxu1 %v3448_v28 }
0x10d0   : > { %3738 = vmatmul.mubr.bf16.vlgmr.msra.gmra.mrb[64].mxu0 %v3445_v29  ;;  %3779 = vmatmul.mubr.bf16.vlgmr.msra.gmra.mrb[64].mxu1 %v3447_v32 }
0x11a3   : > { %v4433_v33 = vpop.f32.mrb[64].mxu0  ;;  %v4455_v35 = vpop.f32.mrb[64].mxu1 }
0x11a4   : > { %v4434_v36 = vpop.f32.mrb[65].mxu0  ;;  %v4456_v38 = vpop.f32.mrb[65].mxu1 }
0x11a5   : > { %v4435_v39 = vadd.f32 %v4434_v36, %v4433_v33  ;;  %v4457_v63 = vadd.f32 %v4456_v38, %v4455_v35  ;;  %v4436_v41 = vpop.f32.mrb[66].mxu0  ;;  %v4458_v42 = vpop.f32.mrb[66].mxu1 }
0x11a6   : > { %v4437_v47 = vpop.f32.mrb[67].mxu0  ;;  %v4459_v59 = vpop.f32.mrb[67].mxu1 }
0x11a7   : > { %v3781_v43 = vadd.f32 %v4457_v63, %v4435_v39  ;;  %v4438_v45 = vadd.f32 %v4437_v47, %v4436_v41  ;;  %v4460_v53 = vadd.f32 %v4459_v59, %v4458_v42 }
0x11a9   : > { %v3784_v46 = vadd.f32 %v4460_v53, %v4438_v45  ;;  %v3787_v50 = vadd.f32 %v3781_v43, %v3283_v1 }
0x11ab   : > { %v3789_v12 = vadd.f32 %v3787_v50, %v5183_v30  ;;  %v3788_v51 = vadd.f32 %v3784_v46, %v3284_v6  ;;  %v4237_v6 = vld [vmem:[%s641_s5] ss:$0 sm:$0xff] }
0x11ad   : > { %v3793_v52 = vsel %vm687_vm2, %v3789_v12, 0.0  ;;  %v3790_v54 = vadd.f32 %v3788_v51, %v5185_v31 }
0x11ae   : > { %3794 = vadd.xlane.f32.xlu0 %v3793_v52 }
0x11af   : > { %v3796_v55 = vsel %vm687_vm2, %v3790_v54, 0.0 }
0x11b0   : > { %3797 = vadd.xlane.f32.xlu1 %v3796_v55 }
0x123b   : > { %v3795_v56 = vpop.xlane.xlu0 %3794 }
0x123c   : > { %v3799_v57 = vmul.f32 0.03125, %v3795_v56 }
0x123d   : > { %v3798_v58 = vpop.xlane.xlu1 %3797 }
0x123e   : > { %v3801_v60 = vsub.f32 %v3789_v12, %v3799_v57  ;;  %v3800_v61 = vmul.f32 0.03125, %v3798_v58 }
0x1240   : > { %v3802_v62 = vsub.f32 %v3790_v54, %v3800_v61  ;;  %v3803_v13 = vmul.f32 %v3801_v60, %v3801_v60 }
0x1242   : > { %v3805_v44 = vsel %vm687_vm2, %v3803_v13, 0.0  ;;  %v3804_v30 = vmul.f32 %v3802_v62, %v3802_v62 }
0x1243   : > { %3806 = vadd.xlane.f32.xlu0 %v3805_v44 }
0x1244   : > { %v3808_v48 = vsel %vm687_vm2, %v3804_v30, 0.0 }
0x1245   : > { %3809 = vadd.xlane.f32.xlu1 %v3808_v48 }
0x12d0   : > { %v3807_v31 = vpop.xlane.xlu0 %3806 }
0x12d1   : > { %v3811_v49 = vmul.f32 0.03125, %v3807_v31 }
0x12d2   : > { %v3810_v0 = vpop.xlane.xlu1 %3809 }
0x12d3   : > { %v3813_v1 = vadd.f32 1e-05, %v3811_v49  ;;  %v3812_v2 = vmul.f32 0.03125, %v3810_v0 }
0x12d5   : > { %4797 = vrsqrt.f32 %v3813_v1  ;;  %v3814_v4 = vadd.f32 1e-05, %v3812_v2 }
0x12d7   : > { %4799 = vrsqrt.f32 %v3814_v4 }
0x12df   : > { %v4798_v5 = vpop.eup %4797 }
0x12e0   : > { %v3817_v7 = vmul.f32 %v4798_v5, %v3801_v60 }
0x12e1   : > { %v4800_v15 = vpop.eup %4799 }
0x12e2   : > { %v3825_v18 = vmul.f32 %v4237_v6, %v3817_v7  ;;  %v3818_v19 = vmul.f32 %v4800_v15, %v3802_v62 }
0x12e4   : > { %v3833_v20 = vadd.f32 %v4238_v17, %v3825_v18  ;;  %v3826_v8 = vmul.f32 %v4237_v6, %v3818_v19 }
0x12e6   : > { %3835 = vst.msk [vmem:[#allocation2] sm:$0xff] %vm687_vm2, %v3833_v20  ;;  %3837 = vst.msk [vmem:[%s5513_s25] sm:$0xff] %vm687_vm2, %v3833_v20  ;;  %v3834_v21 = vadd.f32 %v4238_v17, %v3826_v8 }
0x12e8   : > { %3836 = vst.msk [vmem:[#allocation2 + $0x8] sm:$0xff] %vm687_vm2, %v3834_v21  ;;  %3838 = vst.msk [vmem:[%s5514_s19 + $0x8] sm:$0xff] %vm687_vm2, %v3834_v21 }
0x12e9 PF: > { %s5515_s29 = sld [smem:[#allocation4_spill]]  ;;  %s5516_s25 = sld [smem:[#allocation3_spill]] }
0x12ea   : > { %s5517_s26 = sld [smem:[#allocation5_spill]] }
0x12ef   : > { %s23_s27 = sadd.s32 1, %s5515_s29  }
0x12f0   : > { %p20_p6 = scmp.ge.s32.totalorder %s23_s27, 4  }
0x12f2   :  { %22 = sbr.rel (!%p20_p6) target bundleno = 7 (0x7), region = 142 }

</bundles_post_ra>
